<compile_context>
chip_gen: v7x
topology: tpu7x:2x2x1
jax: 0.10.0
libtpu: 0.0.40
codegen_flags: <defaults>
</compile_context>

<pallas_src>
import jax
import jax.numpy as jnp
from jax.experimental import pallas as pl
from jax.experimental.pallas import tpu as pltpu


def _conv_module_kernel(
    xl_ref,        # (Bb, HALO, C) bf16  left-neighbour rows of x (halo recompute)
    x_ref,         # (Bb, Tt,   C) bf16  main tile of x
    xr_ref,        # (Bb, HALO, C) bf16  right-neighbour rows of x
    w1_ref,        # (C, 2H) bf16  pointwise_conv1 weight, ln_g folded in
    b1_ref,        # (1, 2H) f32   pointwise_conv1 bias, ln_b @ w1 folded in
    dw_w_ref,      # (K, H)  f32   depthwise weight, bn_scale folded in
    bn_shift_ref,  # (1, H)  f32   dw_b*bn_scale + (beta - mean*bn_scale)
    w2_ref,        # (H, C)  bf16  pointwise_conv2 weight
    b2_ref,        # (1, C)  f32
    o_ref,         # (Bb, Tt, C) bf16
    zp_ref,        # VMEM scratch (Bb, Tt + 2*HALO, H) f32
):
    f32 = jnp.float32
    Bb, Tt, C = x_ref.shape
    halo = xl_ref.shape[1]
    K, H = dw_w_ref.shape
    pad = (K - 1) // 2
    rows = Tt + 2 * halo

    t = pl.program_id(1)
    nt = pl.num_programs(1)

    # Weights / small params read once per grid step.
    w1 = w1_ref[...]          # bf16 MXU operand
    b1 = b1_ref[...]
    w2 = w2_ref[...]          # bf16 MXU operand

    # ---- LayerNorm (affine folded into w1/b1) -> 1x1 conv -> GLU ----
    # One merged matmul covers [left halo | main tile | right halo] rows so
    # the halo recompute costs no extra MXU pushes.
    xb = jnp.concatenate([xl_ref[...], x_ref[...], xr_ref[...]], axis=1)
    xf = xb.reshape(Bb * rows, C).astype(f32)
    mu = jnp.mean(xf, axis=-1, keepdims=True)
    var = jnp.mean((xf - mu) ** 2, axis=-1, keepdims=True)
    y = (xf - mu) * jax.lax.rsqrt(var + 1e-5)
    h = jnp.dot(y.astype(w1.dtype), w1, preferred_element_type=f32) + b1
    z = h[:, :H] * jax.nn.sigmoid(h[:, H:])          # GLU along channels
    zp_ref[...] = z.reshape(Bb, rows, H)

    # At the sequence edges the depthwise conv must see zero padding of z,
    # not data (the neighbour halo blocks are clamped duplicates there).
    @pl.when(t == 0)
    def _():
        zp_ref[:, 0:halo, :] = jnp.zeros((Bb, halo, H), f32)

    @pl.when(t == nt - 1)
    def _():
        zp_ref[:, halo + Tt:halo + Tt + halo, :] = jnp.zeros((Bb, halo, H), f32)

    # ---- depthwise conv along time (K taps, "same" padding) ----
    # bn_scale is already folded into the taps; dw_b folded into bn_shift.
    dw = dw_w_ref[...]                                # (K, H), read once
    base = halo - pad
    taps = [zp_ref[:, base + k:base + k + Tt, :] * dw[k].reshape(1, 1, H)
            for k in range(K)]
    # Pairwise tree-sum: dependent-VALU chain depth ceil(log2(K)) instead of K.
    while len(taps) > 1:
        nxt = [taps[i] + taps[i + 1] for i in range(0, len(taps) - 1, 2)]
        if len(taps) % 2:
            nxt.append(taps[-1])
        taps = nxt
    u = taps[0] + bn_shift_ref[...]

    # ---- SiLU (swish), f32 ----
    u = u * jax.nn.sigmoid(u)

    # ---- pointwise_conv2 (1x1): (Bb*Tt, H) @ (H, C) on the MXU ----
    uf = u.reshape(Bb * Tt, H)
    out = jnp.dot(uf.astype(w2.dtype), w2, preferred_element_type=f32) + b2_ref[...]

    # Dropout: identity in eval mode.
    o_ref[...] = out.reshape(o_ref.shape).astype(o_ref.dtype)


def _vmem_capacity_bytes():
    """Per-chip physical VMEM (v5e/v6e: 128 MiB, v7x: 64 MiB per core)."""
    try:
        return int(pltpu.get_tpu_info().vmem_capacity_bytes)
    except Exception:
        return 64 * 1024 * 1024   # conservative fallback (v7x)


def _default_tiles(B, T, halo, C, H, vmem_cap):
    """Pick (batch_block, time_block): large time tiles, >=512 matmul rows."""
    time_block = T
    for cand in (1024, 512, 256, 128, 64, 32, 16, 8):
        if cand <= T and T % cand == 0 and cand % halo == 0:
            time_block = cand
            break
    batch_block = 1
    while (batch_block * 2 <= B and B % (batch_block * 2) == 0
           and batch_block * time_block < 512):
        batch_block *= 2

    def tile_bytes(bb, tt):
        x_blk = bb * tt * C * 2           # bf16 input block
        halo_blk = bb * halo * C * 2
        out_blk = bb * tt * C * 2
        scratch = bb * (tt + 2 * halo) * H * 4
        return 2 * (x_blk + 2 * halo_blk + out_blk) + scratch

    budget = max(vmem_cap * 2 // 5, 8 * 1024 * 1024)
    while tile_bytes(batch_block, time_block) > budget:
        if batch_block > 1:
            batch_block //= 2
        elif (time_block > halo and time_block % 2 == 0
              and (time_block // 2) % halo == 0 and T % (time_block // 2) == 0):
            time_block //= 2
        else:
            break
    return batch_block, time_block


def _vmem_bytes_estimate(batch_block, time_block, halo, C, H, folded):
    """Rough per-core VMEM budget: double-buffered blocks + weights + scratch."""
    x_blk = batch_block * time_block * C * 2          # bf16
    halo_blk = batch_block * halo * C * 2
    out_blk = batch_block * time_block * C * 2
    weights = sum(int(v.size) * v.dtype.itemsize for v in folded.values())
    scratch = batch_block * (time_block + 2 * halo) * H * 4
    return 2 * (x_blk + 2 * halo_blk + out_blk + weights) + scratch


def _fold_params(p):
    """Host-side constant folding: LN affine into w1/b1, BN affine + dw bias
    into the depthwise taps / a single shift vector. bf16 MXU operands."""
    f32, bf16 = jnp.float32, jnp.bfloat16
    ln_g = p["ln_g"].reshape(-1).astype(f32)                  # (C,)
    ln_b = p["ln_b"].reshape(-1).astype(f32)                  # (C,)
    w1 = p["w1"].astype(f32)                                  # (C, 2H)
    b1 = p["b1"].reshape(1, -1).astype(f32)                   # (1, 2H)
    w1_f = ln_g[:, None] * w1
    b1_f = b1 + ln_b[None, :] @ w1

    eps = float(p["bn_eps"])
    s = (p["bn_gamma"].reshape(-1) /
         jnp.sqrt(p["bn_var"].reshape(-1) + eps)).astype(f32)  # (H,)
    dw_f = p["dw_w"].astype(f32) * s[None, :]                  # (K, H)
    shift = (p["dw_b"].reshape(-1) * s
             + p["bn_beta"].reshape(-1)
             - p["bn_mean"].reshape(-1) * s).reshape(1, -1).astype(f32)

    return {
        "w1": w1_f.astype(bf16),
        "b1": b1_f,
        "dw_w": dw_f,
        "bn_shift": shift,
        "w2": p["w2"].astype(bf16),
        "b2": p["b2"].reshape(1, -1).astype(f32),
    }


def conformer_conv_module(x, params, *, batch_block=None, time_block=None):
    """x: (B, T, C); params: raw dict (see make_params). Returns bf16 (B,T,C)."""
    B, T, C = x.shape
    K, H = params["dw_w"].shape
    pad = (K - 1) // 2
    halo = max(8, -(-pad // 8) * 8)   # halo rows: multiple of 8, >= pad

    folded = _fold_params(params)
    x = x.astype(jnp.bfloat16)        # bf16 HBM boundary

    vmem_cap = _vmem_capacity_bytes()
    if batch_block is None or time_block is None:
        db, dt = _default_tiles(B, T, halo, C, H, vmem_cap)
        batch_block = db if batch_block is None else batch_block
        time_block = dt if time_block is None else time_block

    assert B % batch_block == 0, (B, batch_block)
    assert T % time_block == 0, (T, time_block)
    assert T % halo == 0, (T, halo)
    assert time_block % halo == 0, (time_block, halo)
    assert halo >= pad

    ratio = time_block // halo
    n_halo_blocks = T // halo
    grid = (B // batch_block, T // time_block)

    def const_spec(shape):
        zeros = (0,) * len(shape)
        return pl.BlockSpec(shape, lambda b, t, _z=zeros: _z)

    in_specs = [
        # left halo / main / right halo views of x (recompute-halo T tiling)
        pl.BlockSpec((batch_block, halo, C),
                     lambda b, t: (b, jnp.maximum(t * ratio - 1, 0), 0)),
        pl.BlockSpec((batch_block, time_block, C), lambda b, t: (b, t, 0)),
        pl.BlockSpec((batch_block, halo, C),
                     lambda b, t: (b, jnp.minimum((t + 1) * ratio,
                                                  n_halo_blocks - 1), 0)),
        const_spec(folded["w1"].shape),
        const_spec(folded["b1"].shape),
        const_spec(folded["dw_w"].shape),
        const_spec(folded["bn_shift"].shape),
        const_spec(folded["w2"].shape),
        const_spec(folded["b2"].shape),
    ]
    out_spec = pl.BlockSpec((batch_block, time_block, C), lambda b, t: (b, t, 0))

    scratch_shapes = [
        pltpu.VMEM((batch_block, time_block + 2 * halo, H), jnp.float32),
    ]

    # Derive the VMEM budget; only raise the scoped limit when actually needed
    # and never exceed 85% of this generation's physical VMEM.
    est = _vmem_bytes_estimate(batch_block, time_block, halo, C, H, folded)
    vmem_limit = None
    if est > 32 * 1024 * 1024:
        vmem_limit = int(min(est * 5 // 4, vmem_cap * 85 // 100))

    return pl.pallas_call(
        _conv_module_kernel,
        out_shape=jax.ShapeDtypeStruct((B, T, C), jnp.bfloat16),
        grid_spec=pltpu.PrefetchScalarGridSpec(
            num_scalar_prefetch=0,
            grid=grid,
            in_specs=in_specs,
            out_specs=out_spec,
            scratch_shapes=scratch_shapes,
        ),
        compiler_params=pltpu.CompilerParams(
            dimension_semantics=("parallel", "parallel"),
            vmem_limit_bytes=vmem_limit,
        ),
    )(
        x, x, x,
        folded["w1"], folded["b1"],
        folded["dw_w"], folded["bn_shift"],
        folded["w2"], folded["b2"],
    )


def make_params(input_channels, hidden_channels, depthwise_kernel_size, key):
    """Deterministic synthetic parameters matching the PyTorch module shapes
    (raw / unfolded layout; non-trivial affines so folding is exercised)."""
    C, H, K = input_channels, hidden_channels, depthwise_kernel_size
    ks = jax.random.split(key, 12)
    f32 = jnp.float32
    return {
        # LayerNorm
        "ln_g": 1.0 + 0.1 * jax.random.normal(ks[0], (C,), f32),
        "ln_b": 0.1 * jax.random.normal(ks[1], (C,), f32),
        # pointwise_conv1: Conv1d weight (2H, C, 1) -> stored transposed (C, 2H)
        "w1": 0.08 * jax.random.normal(ks[2], (C, 2 * H), f32),
        "b1": 0.1 * jax.random.normal(ks[3], (2 * H,), f32),
        # depthwise conv: weight (H, 1, K) -> stored tap-major (K, H)
        "dw_w": 0.3 * jax.random.normal(ks[4], (K, H), f32),
        "dw_b": 0.1 * jax.random.normal(ks[5], (H,), f32),
        # BatchNorm1d (eval running stats)
        "bn_gamma": 1.0 + 0.1 * jax.random.normal(ks[6], (H,), f32),
        "bn_beta": 0.1 * jax.random.normal(ks[7], (H,), f32),
        "bn_mean": 0.1 * jax.random.normal(ks[8], (H,), f32),
        "bn_var": 1.0 + 0.2 * jax.random.uniform(ks[9], (H,), f32),
        "bn_eps": 1e-5,
        # pointwise_conv2: Conv1d weight (C, H, 1) -> stored transposed (H, C)
        "w2": 0.08 * jax.random.normal(ks[10], (H, C), f32),
        "b2": 0.1 * jax.random.normal(ks[11], (C,), f32),
    }


def reference_forward(x_bf16, params):
    """Pure-JAX reference on the RAW (unfolded) params; bf16 matmul operands,
    f32 accumulation and f32 elementwise, mirroring the kernel's precision."""
    f32, bf16 = jnp.float32, jnp.bfloat16
    K, H = params["dw_w"].shape
    pad = (K - 1) // 2
    T = x_bf16.shape[1]
    x = x_bf16.astype(f32)

    mu = jnp.mean(x, axis=-1, keepdims=True)
    var = jnp.mean((x - mu) ** 2, axis=-1, keepdims=True)
    y = (x - mu) * jax.lax.rsqrt(var + 1e-5) * params["ln_g"] + params["ln_b"]

    h = jnp.dot(y.astype(bf16), params["w1"].astype(bf16),
                preferred_element_type=f32) + params["b1"]
    z = h[..., :H] * jax.nn.sigmoid(h[..., H:])

    zp = jnp.pad(z, ((0, 0), (pad, pad), (0, 0)))
    acc = jnp.zeros_like(z)
    for k in range(K):
        acc = acc + zp[:, k:k + T, :] * params["dw_w"][k]
    acc = acc + params["dw_b"]

    s = params["bn_gamma"] / jnp.sqrt(params["bn_var"] + params["bn_eps"])
    u = (acc - params["bn_mean"]) * s + params["bn_beta"]
    u = u * jax.nn.sigmoid(u)

    out = jnp.dot(u.astype(bf16), params["w2"].astype(bf16),
                  preferred_element_type=f32)
    return out + params["b2"]


if __name__ == "__main__":
    # Small but lane-dense shapes: batch=4, seq=128, channels=128, hidden=128,
    # depthwise kernel K=7.  Explicit tiles (Bb=2, Tt=64) give a (2, 2) grid,
    # 128 matmul rows per step, and exercise both interior-halo and
    # sequence-edge (zero padding) paths.
    B, T, C_in, H, K = 4, 128, 128, 128, 7

    root = jax.random.PRNGKey(0)
    kx, kp = jax.random.split(root)
    x = jax.random.normal(kx, (B, T, C_in), jnp.float32).astype(jnp.bfloat16)
    params = make_params(C_in, H, K, kp)

    out = conformer_conv_module(x, params, batch_block=2, time_block=64)
    out = jax.block_until_ready(out)

    assert out.shape == (B, T, C_in), out.shape
    assert out.dtype == jnp.bfloat16, out.dtype
    out_f32 = out.astype(jnp.float32)
    assert bool(jnp.all(jnp.isfinite(out_f32)))

    ref = reference_forward(x, params)
    max_err = float(jnp.max(jnp.abs(out_f32 - ref)))
    assert max_err < 3e-2, f"kernel/reference mismatch: max abs err = {max_err}"

    print("KERNEL_OK")
</pallas_src>

<mosaic_0001>
module attributes {stable_mosaic.version = 11 : i64} {
  func.func @_conv_module_kernel(%arg0: i32, %arg1: i32, %arg2: memref<2x8x128xbf16, #tpu.memory_space<vmem>>, %arg3: memref<2x64x128xbf16, #tpu.memory_space<vmem>>, %arg4: memref<2x8x128xbf16, #tpu.memory_space<vmem>>, %arg5: memref<128x256xbf16, #tpu.memory_space<vmem>>, %arg6: memref<1x256xf32, #tpu.memory_space<vmem>>, %arg7: memref<7x128xf32, #tpu.memory_space<vmem>>, %arg8: memref<1x128xf32, #tpu.memory_space<vmem>>, %arg9: memref<128x128xbf16, #tpu.memory_space<vmem>>, %arg10: memref<1x128xf32, #tpu.memory_space<vmem>>, %arg11: memref<2x64x128xbf16, #tpu.memory_space<vmem>>, %arg12: memref<2x80x128xf32, #tpu.memory_space<vmem>>) attributes {dimension_semantics = [#tpu.dimension_semantics<parallel>, #tpu.dimension_semantics<parallel>], iteration_bounds = array<i64: 2, 2>, scalar_prefetch = 0 : i64, scratch_operands = 1 : i64, tpu.core_type = #tpu.core_type<tc>, window_params = [{transform_indices = @transform_0, window_bounds = array<i64: 2, 8, 128>}, {transform_indices = @transform_1, window_bounds = array<i64: 2, 64, 128>}, {transform_indices = @transform_2, window_bounds = array<i64: 2, 8, 128>}, {pipeline_mode = #tpu.pipeline_mode<synchronous>, transform_indices = @transform_3, window_bounds = array<i64: 128, 256>}, {pipeline_mode = #tpu.pipeline_mode<synchronous>, transform_indices = @transform_4, window_bounds = array<i64: 1, 256>}, {pipeline_mode = #tpu.pipeline_mode<synchronous>, transform_indices = @transform_5, window_bounds = array<i64: 7, 128>}, {pipeline_mode = #tpu.pipeline_mode<synchronous>, transform_indices = @transform_6, window_bounds = array<i64: 1, 128>}, {pipeline_mode = #tpu.pipeline_mode<synchronous>, transform_indices = @transform_7, window_bounds = array<i64: 128, 128>}, {pipeline_mode = #tpu.pipeline_mode<synchronous>, transform_indices = @transform_8, window_bounds = array<i64: 1, 128>}, {transform_indices = @transform_9, window_bounds = array<i64: 2, 64, 128>}]} {
    %c0 = arith.constant 0 : index
    %c0_0 = arith.constant 0 : index
    %0 = vector.load %arg5[%c0, %c0_0] : memref<128x256xbf16, #tpu.memory_space<vmem>>, vector<128x256xbf16>
    %c0_1 = arith.constant 0 : index
    %c0_2 = arith.constant 0 : index
    %1 = vector.load %arg6[%c0_1, %c0_2] : memref<1x256xf32, #tpu.memory_space<vmem>>, vector<1x256xf32>
    %c0_3 = arith.constant 0 : index
    %c0_4 = arith.constant 0 : index
    %2 = vector.load %arg9[%c0_3, %c0_4] : memref<128x128xbf16, #tpu.memory_space<vmem>>, vector<128x128xbf16>
    %c0_5 = arith.constant 0 : index
    %c0_6 = arith.constant 0 : index
    %c0_7 = arith.constant 0 : index
    %3 = vector.load %arg2[%c0_5, %c0_6, %c0_7] : memref<2x8x128xbf16, #tpu.memory_space<vmem>>, vector<2x8x128xbf16>
    %c0_8 = arith.constant 0 : index
    %c0_9 = arith.constant 0 : index
    %c0_10 = arith.constant 0 : index
    %4 = vector.load %arg3[%c0_8, %c0_9, %c0_10] : memref<2x64x128xbf16, #tpu.memory_space<vmem>>, vector<2x64x128xbf16>
    %c0_11 = arith.constant 0 : index
    %c0_12 = arith.constant 0 : index
    %c0_13 = arith.constant 0 : index
    %5 = vector.load %arg4[%c0_11, %c0_12, %c0_13] : memref<2x8x128xbf16, #tpu.memory_space<vmem>>, vector<2x8x128xbf16>
    %6 = tpu.concatenate %3, %4, %5 in 1 : vector<2x8x128xbf16>, vector<2x64x128xbf16>, vector<2x8x128xbf16> -> vector<2x80x128xbf16>
    %7 = vector.shape_cast %6 : vector<2x80x128xbf16> to vector<160x128xbf16>
    %8 = arith.extf %7 : vector<160x128xbf16> to vector<160x128xf32>
    %cst = arith.constant dense<0.000000e+00> : vector<160xf32>
    %9 = vector.multi_reduction <add>, %8, %cst [1] : vector<160x128xf32> to vector<160xf32>
    %10 = vector.shape_cast %9 : vector<160xf32> to vector<160x1xf32>
    %cst_14 = arith.constant 1.280000e+02 : f32
    %11 = vector.broadcast %cst_14 : f32 to vector<160x1xf32>
    %12 = arith.divf %10, %11 : vector<160x1xf32>
    %13 = vector.broadcast %12 : vector<160x1xf32> to vector<160x128xf32>
    %14 = arith.subf %8, %13 : vector<160x128xf32>
    %15 = arith.mulf %14, %14 : vector<160x128xf32>
    %cst_15 = arith.constant dense<0.000000e+00> : vector<160xf32>
    %16 = vector.multi_reduction <add>, %15, %cst_15 [1] : vector<160x128xf32> to vector<160xf32>
    %17 = vector.shape_cast %16 : vector<160xf32> to vector<160x1xf32>
    %cst_16 = arith.constant 1.280000e+02 : f32
    %18 = vector.broadcast %cst_16 : f32 to vector<160x1xf32>
    %19 = arith.divf %17, %18 : vector<160x1xf32>
    %20 = vector.broadcast %12 : vector<160x1xf32> to vector<160x128xf32>
    %21 = arith.subf %8, %20 : vector<160x128xf32>
    %cst_17 = arith.constant 9.99999974E-6 : f32
    %22 = vector.broadcast %cst_17 : f32 to vector<160x1xf32>
    %23 = arith.addf %19, %22 : vector<160x1xf32>
    %24 = math.rsqrt %23 : vector<160x1xf32>
    %25 = vector.broadcast %24 : vector<160x1xf32> to vector<160x128xf32>
    %26 = arith.mulf %21, %25 : vector<160x128xf32>
    %27 = arith.truncf %26 : vector<160x128xf32> to vector<160x128xbf16>
    %cst_18 = arith.constant dense<0.000000e+00> : vector<160x256xf32>
    %28 = tpu.matmul %27, %0, %cst_18 {dimension_numbers = #tpu.dot_dimension_numbers<[1], [0], [0], [1], [0, 0, 1, 1], [], []>} : vector<160x128xbf16>, vector<128x256xbf16>, vector<160x256xf32> -> vector<160x256xf32>
    %29 = vector.broadcast %1 : vector<1x256xf32> to vector<160x256xf32>
    %30 = arith.addf %28, %29 : vector<160x256xf32>
    %31 = vector.extract_strided_slice %30 {offsets = [0, 0], sizes = [160, 128], strides = [1, 1]} : vector<160x256xf32> to vector<160x128xf32>
    %32 = vector.extract_strided_slice %30 {offsets = [0, 128], sizes = [160, 128], strides = [1, 1]} : vector<160x256xf32> to vector<160x128xf32>
    %33 = arith.negf %32 : vector<160x128xf32>
    %34 = math.exp %33 : vector<160x128xf32>
    %cst_19 = arith.constant 1.000000e+00 : f32
    %35 = vector.broadcast %cst_19 : f32 to vector<160x128xf32>
    %36 = arith.addf %35, %34 : vector<160x128xf32>
    %37 = arith.divf %35, %36 : vector<160x128xf32>
    %38 = arith.mulf %31, %37 : vector<160x128xf32>
    %39 = vector.shape_cast %38 : vector<160x128xf32> to vector<2x80x128xf32>
    %c0_20 = arith.constant 0 : index
    %c0_21 = arith.constant 0 : index
    %c0_22 = arith.constant 0 : index
    %40 = vector.load %arg12[%c0_20, %c0_21, %c0_22] : memref<2x80x128xf32, #tpu.memory_space<vmem>>, vector<2x80x128xf32>
    tpu.vector_store %arg12[%c0_20, %c0_21, %c0_22], %39 {strides = array<i32>} : memref<2x80x128xf32, #tpu.memory_space<vmem>>, vector<2x80x128xf32>,
    %c0_i32 = arith.constant 0 : i32
    %41 = arith.cmpi eq, %arg1, %c0_i32 : i32
    %42 = arith.extui %41 : i1 to i32
    %c0_i32_23 = arith.constant 0 : i32
    %43 = arith.cmpi ne, %42, %c0_i32_23 : i32
    scf.if %43 {
      %cst_50 = arith.constant 0.000000e+00 : f32
      %115 = vector.broadcast %cst_50 : f32 to vector<2x8x128xf32>
      %c0_51 = arith.constant 0 : index
      %c0_52 = arith.constant 0 : index
      %c0_53 = arith.constant 0 : index
      %116 = vector.load %arg12[%c0_51, %c0_52, %c0_53] : memref<2x80x128xf32, #tpu.memory_space<vmem>>, vector<2x8x128xf32>
      tpu.vector_store %arg12[%c0_51, %c0_52, %c0_53], %115 {strides = array<i32>} : memref<2x80x128xf32, #tpu.memory_space<vmem>>, vector<2x8x128xf32>,
    } else {
    }
    %c1_i32 = arith.constant 1 : i32
    %44 = arith.cmpi eq, %arg1, %c1_i32 : i32
    %45 = arith.extui %44 : i1 to i32
    %c0_i32_24 = arith.constant 0 : i32
    %46 = arith.cmpi ne, %45, %c0_i32_24 : i32
    scf.if %46 {
      %cst_50 = arith.constant 0.000000e+00 : f32
      %115 = vector.broadcast %cst_50 : f32 to vector<2x8x128xf32>
      %c0_51 = arith.constant 0 : index
      %c72 = arith.constant 72 : index
      %c0_52 = arith.constant 0 : index
      %116 = vector.load %arg12[%c0_51, %c72, %c0_52] : memref<2x80x128xf32, #tpu.memory_space<vmem>>, vector<2x8x128xf32>
      tpu.vector_store %arg12[%c0_51, %c72, %c0_52], %115 {strides = array<i32>} : memref<2x80x128xf32, #tpu.memory_space<vmem>>, vector<2x8x128xf32>,
    } else {
    }
    %c0_25 = arith.constant 0 : index
    %c0_26 = arith.constant 0 : index
    %47 = vector.load %arg7[%c0_25, %c0_26] : memref<7x128xf32, #tpu.memory_space<vmem>>, vector<7x128xf32>
    %c0_27 = arith.constant 0 : index
    %c5 = arith.constant 5 : index
    %c0_28 = arith.constant 0 : index
    %48 = vector.load %arg12[%c0_27, %c5, %c0_28] : memref<2x80x128xf32, #tpu.memory_space<vmem>>, vector<2x64x128xf32>
    %49 = vector.extract_strided_slice %47 {offsets = [0, 0], sizes = [1, 128], strides = [1, 1]} : vector<7x128xf32> to vector<1x128xf32>
    %50 = vector.shape_cast %49 : vector<1x128xf32> to vector<128xf32>
    %51 = vector.shape_cast %50 : vector<128xf32> to vector<1x1x128xf32>
    %52 = vector.broadcast %51 : vector<1x1x128xf32> to vector<2x64x128xf32>
    %53 = arith.mulf %48, %52 : vector<2x64x128xf32>
    %c0_29 = arith.constant 0 : index
    %c6 = arith.constant 6 : index
    %c0_30 = arith.constant 0 : index
    %54 = vector.load %arg12[%c0_29, %c6, %c0_30] : memref<2x80x128xf32, #tpu.memory_space<vmem>>, vector<2x64x128xf32>
    %55 = vector.extract_strided_slice %47 {offsets = [1, 0], sizes = [1, 128], strides = [1, 1]} : vector<7x128xf32> to vector<1x128xf32>
    %56 = vector.shape_cast %55 : vector<1x128xf32> to vector<128xf32>
    %57 = vector.shape_cast %56 : vector<128xf32> to vector<1x1x128xf32>
    %58 = vector.broadcast %57 : vector<1x1x128xf32> to vector<2x64x128xf32>
    %59 = arith.mulf %54, %58 : vector<2x64x128xf32>
    %c0_31 = arith.constant 0 : index
    %c7 = arith.constant 7 : index
    %c0_32 = arith.constant 0 : index
    %60 = vector.load %arg12[%c0_31, %c7, %c0_32] : memref<2x80x128xf32, #tpu.memory_space<vmem>>, vector<2x64x128xf32>
    %61 = vector.extract_strided_slice %47 {offsets = [2, 0], sizes = [1, 128], strides = [1, 1]} : vector<7x128xf32> to vector<1x128xf32>
    %62 = vector.shape_cast %61 : vector<1x128xf32> to vector<128xf32>
    %63 = vector.shape_cast %62 : vector<128xf32> to vector<1x1x128xf32>
    %64 = vector.broadcast %63 : vector<1x1x128xf32> to vector<2x64x128xf32>
    %65 = arith.mulf %60, %64 : vector<2x64x128xf32>
    %c0_33 = arith.constant 0 : index
    %c8 = arith.constant 8 : index
    %c0_34 = arith.constant 0 : index
    %66 = vector.load %arg12[%c0_33, %c8, %c0_34] : memref<2x80x128xf32, #tpu.memory_space<vmem>>, vector<2x64x128xf32>
    %67 = vector.extract_strided_slice %47 {offsets = [3, 0], sizes = [1, 128], strides = [1, 1]} : vector<7x128xf32> to vector<1x128xf32>
    %68 = vector.shape_cast %67 : vector<1x128xf32> to vector<128xf32>
    %69 = vector.shape_cast %68 : vector<128xf32> to vector<1x1x128xf32>
    %70 = vector.broadcast %69 : vector<1x1x128xf32> to vector<2x64x128xf32>
    %71 = arith.mulf %66, %70 : vector<2x64x128xf32>
    %c0_35 = arith.constant 0 : index
    %c9 = arith.constant 9 : index
    %c0_36 = arith.constant 0 : index
    %72 = vector.load %arg12[%c0_35, %c9, %c0_36] : memref<2x80x128xf32, #tpu.memory_space<vmem>>, vector<2x64x128xf32>
    %73 = vector.extract_strided_slice %47 {offsets = [4, 0], sizes = [1, 128], strides = [1, 1]} : vector<7x128xf32> to vector<1x128xf32>
    %74 = vector.shape_cast %73 : vector<1x128xf32> to vector<128xf32>
    %75 = vector.shape_cast %74 : vector<128xf32> to vector<1x1x128xf32>
    %76 = vector.broadcast %75 : vector<1x1x128xf32> to vector<2x64x128xf32>
    %77 = arith.mulf %72, %76 : vector<2x64x128xf32>
    %c0_37 = arith.constant 0 : index
    %c10 = arith.constant 10 : index
    %c0_38 = arith.constant 0 : index
    %78 = vector.load %arg12[%c0_37, %c10, %c0_38] : memref<2x80x128xf32, #tpu.memory_space<vmem>>, vector<2x64x128xf32>
    %79 = vector.extract_strided_slice %47 {offsets = [5, 0], sizes = [1, 128], strides = [1, 1]} : vector<7x128xf32> to vector<1x128xf32>
    %80 = vector.shape_cast %79 : vector<1x128xf32> to vector<128xf32>
    %81 = vector.shape_cast %80 : vector<128xf32> to vector<1x1x128xf32>
    %82 = vector.broadcast %81 : vector<1x1x128xf32> to vector<2x64x128xf32>
    %83 = arith.mulf %78, %82 : vector<2x64x128xf32>
    %c0_39 = arith.constant 0 : index
    %c11 = arith.constant 11 : index
    %c0_40 = arith.constant 0 : index
    %84 = vector.load %arg12[%c0_39, %c11, %c0_40] : memref<2x80x128xf32, #tpu.memory_space<vmem>>, vector<2x64x128xf32>
    %85 = vector.extract_strided_slice %47 {offsets = [6, 0], sizes = [1, 128], strides = [1, 1]} : vector<7x128xf32> to vector<1x128xf32>
    %86 = vector.shape_cast %85 : vector<1x128xf32> to vector<128xf32>
    %87 = vector.shape_cast %86 : vector<128xf32> to vector<1x1x128xf32>
    %88 = vector.broadcast %87 : vector<1x1x128xf32> to vector<2x64x128xf32>
    %89 = arith.mulf %84, %88 : vector<2x64x128xf32>
    %90 = arith.addf %53, %59 : vector<2x64x128xf32>
    %91 = arith.addf %65, %71 : vector<2x64x128xf32>
    %92 = arith.addf %77, %83 : vector<2x64x128xf32>
    %93 = arith.addf %90, %91 : vector<2x64x128xf32>
    %94 = arith.addf %92, %89 : vector<2x64x128xf32>
    %95 = arith.addf %93, %94 : vector<2x64x128xf32>
    %c0_41 = arith.constant 0 : index
    %c0_42 = arith.constant 0 : index
    %96 = vector.load %arg8[%c0_41, %c0_42] : memref<1x128xf32, #tpu.memory_space<vmem>>, vector<1x128xf32>
    %97 = vector.shape_cast %96 : vector<1x128xf32> to vector<1x1x128xf32>
    %98 = vector.broadcast %97 : vector<1x1x128xf32> to vector<2x64x128xf32>
    %99 = arith.addf %95, %98 : vector<2x64x128xf32>
    %100 = arith.negf %99 : vector<2x64x128xf32>
    %101 = math.exp %100 : vector<2x64x128xf32>
    %cst_43 = arith.constant 1.000000e+00 : f32
    %102 = vector.broadcast %cst_43 : f32 to vector<2x64x128xf32>
    %103 = arith.addf %102, %101 : vector<2x64x128xf32>
    %104 = arith.divf %102, %103 : vector<2x64x128xf32>
    %105 = arith.mulf %99, %104 : vector<2x64x128xf32>
    %106 = vector.shape_cast %105 : vector<2x64x128xf32> to vector<128x128xf32>
    %107 = arith.truncf %106 : vector<128x128xf32> to vector<128x128xbf16>
    %cst_44 = arith.constant dense<0.000000e+00> : vector<128x128xf32>
    %108 = tpu.matmul %107, %2, %cst_44 {dimension_numbers = #tpu.dot_dimension_numbers<[1], [0], [0], [1], [0, 0, 1, 1], [], []>} : vector<128x128xbf16>, vector<128x128xbf16>, vector<128x128xf32> -> vector<128x128xf32>
    %c0_45 = arith.constant 0 : index
    %c0_46 = arith.constant 0 : index
    %109 = vector.load %arg10[%c0_45, %c0_46] : memref<1x128xf32, #tpu.memory_space<vmem>>, vector<1x128xf32>
    %110 = vector.broadcast %109 : vector<1x128xf32> to vector<128x128xf32>
    %111 = arith.addf %108, %110 : vector<128x128xf32>
    %112 = vector.shape_cast %111 : vector<128x128xf32> to vector<2x64x128xf32>
    %113 = arith.truncf %112 : vector<2x64x128xf32> to vector<2x64x128xbf16>
    %c0_47 = arith.constant 0 : index
    %c0_48 = arith.constant 0 : index
    %c0_49 = arith.constant 0 : index
    %114 = vector.load %arg11[%c0_47, %c0_48, %c0_49] : memref<2x64x128xbf16, #tpu.memory_space<vmem>>, vector<2x64x128xbf16>
    tpu.vector_store %arg11[%c0_47, %c0_48, %c0_49], %113 {strides = array<i32>} : memref<2x64x128xbf16, #tpu.memory_space<vmem>>, vector<2x64x128xbf16>,
    return
  }
  func.func @transform_0(%arg0: i32, %arg1: i32) -> (i32, i32, i32) {
    %c8_i32 = arith.constant 8 : i32
    %0 = arith.muli %arg1, %c8_i32 : i32
    %c1_i32 = arith.constant 1 : i32
    %1 = arith.subi %0, %c1_i32 : i32
    %c0_i32 = arith.constant 0 : i32
    %2 = arith.maxsi %1, %c0_i32 : i32
    %c0_i32_0 = arith.constant 0 : i32
    %c0_i32_1 = arith.constant 0 : i32
    return %arg0, %2, %c0_i32_0 : i32, i32, i32
  }
  func.func @transform_1(%arg0: i32, %arg1: i32) -> (i32, i32, i32) {
    %c0_i32 = arith.constant 0 : i32
    %c0_i32_0 = arith.constant 0 : i32
    return %arg0, %arg1, %c0_i32 : i32, i32, i32
  }
  func.func @transform_2(%arg0: i32, %arg1: i32) -> (i32, i32, i32) {
    %c1_i32 = arith.constant 1 : i32
    %0 = arith.addi %arg1, %c1_i32 : i32
    %c8_i32 = arith.constant 8 : i32
    %1 = arith.muli %0, %c8_i32 : i32
    %c15_i32 = arith.constant 15 : i32
    %2 = arith.minsi %1, %c15_i32 : i32
    %c0_i32 = arith.constant 0 : i32
    %c0_i32_0 = arith.constant 0 : i32
    return %arg0, %2, %c0_i32 : i32, i32, i32
  }
  func.func @transform_3(%arg0: i32, %arg1: i32) -> (i32, i32) {
    %c0_i32 = arith.constant 0 : i32
    %c0_i32_0 = arith.constant 0 : i32
    %c0_i32_1 = arith.constant 0 : i32
    return %c0_i32, %c0_i32_0 : i32, i32
  }
  func.func @transform_4(%arg0: i32, %arg1: i32) -> (i32, i32) {
    %c0_i32 = arith.constant 0 : i32
    %c0_i32_0 = arith.constant 0 : i32
    %c0_i32_1 = arith.constant 0 : i32
    return %c0_i32, %c0_i32_0 : i32, i32
  }
  func.func @transform_5(%arg0: i32, %arg1: i32) -> (i32, i32) {
    %c0_i32 = arith.constant 0 : i32
    %c0_i32_0 = arith.constant 0 : i32
    %c0_i32_1 = arith.constant 0 : i32
    return %c0_i32, %c0_i32_0 : i32, i32
  }
  func.func @transform_6(%arg0: i32, %arg1: i32) -> (i32, i32) {
    %c0_i32 = arith.constant 0 : i32
    %c0_i32_0 = arith.constant 0 : i32
    %c0_i32_1 = arith.constant 0 : i32
    return %c0_i32, %c0_i32_0 : i32, i32
  }
  func.func @transform_7(%arg0: i32, %arg1: i32) -> (i32, i32) {
    %c0_i32 = arith.constant 0 : i32
    %c0_i32_0 = arith.constant 0 : i32
    %c0_i32_1 = arith.constant 0 : i32
    return %c0_i32, %c0_i32_0 : i32, i32
  }
  func.func @transform_8(%arg0: i32, %arg1: i32) -> (i32, i32) {
    %c0_i32 = arith.constant 0 : i32
    %c0_i32_0 = arith.constant 0 : i32
    %c0_i32_1 = arith.constant 0 : i32
    return %c0_i32, %c0_i32_0 : i32, i32
  }
  func.func @transform_9(%arg0: i32, %arg1: i32) -> (i32, i32, i32) {
    %c0_i32 = arith.constant 0 : i32
    %c0_i32_0 = arith.constant 0 : i32
    return %arg0, %arg1, %c0_i32 : i32, i32, i32
  }
}

</mosaic_0001>

<bundles_post_ra>
// kernel: tpu_custom_call.1
= control target key start
LH: loop header
LB: loop body
LE: loop exit
PB: predicated region body
PF: predicated region fallthrough
CT: control target
= control target key end

     0   :  { %s4333_s0 = inlined_call_operand.hbm [shape: bf16[4,128,128], index: 0, kind: input, shape index: {}]   ;;  %s4334_s1 = inlined_call_operand.hbm [shape: bf16[4,128,128], index: 1, kind: input, shape index: {}]   ;;  %s4335_s2 = inlined_call_operand.hbm [shape: bf16[4,128,128], index: 2, kind: input, shape index: {}]   ;;  %s4336_s3 = inlined_call_operand.hbm [shape: bf16[128,256], index: 3, kind: input, shape index: {}]   ;;  %s4337_s4 = inlined_call_operand.vmem [shape: f32[1,256], index: 4, kind: input, shape index: {}]   ;;  %s4338_s5 = inlined_call_operand.vmem [shape: f32[7,128], index: 5, kind: input, shape index: {}]   ;;  %s4339_s6 = inlined_call_operand.vmem [shape: f32[1,128], index: 6, kind: input, shape index: {}]   ;;  %s4340_s7 = inlined_call_operand.hbm [shape: bf16[128,128], index: 7, kind: input, shape index: {}]   ;;  %s4341_s8 = inlined_call_operand.vmem [shape: f32[1,128], index: 8, kind: input, shape index: {}]   ;;  %s4342_s9 = inlined_call_operand.hbm [shape: bf16[4,128,128], index: 9, kind: output, shape index: {}]  }
   0x1   :  { %4376 = sst [smem:[#allocation40_spill]] %s4335_s2 }
   0x2   :  { %4377 = sst [smem:[#allocation41_spill]] %s4337_s4 }
   0x3   :  { %4378 = sst [smem:[#allocation42_spill]] %s4338_s5 }
   0x4   :  { %4379 = sst [smem:[#allocation43_spill]] %s4339_s6 }
   0x5   :  { %4380 = sst [smem:[#allocation44_spill]] %s4341_s8 }
   0x6   :  { %4381 = sst [smem:[#allocation45_spill]] %s4342_s9 }
   0x7   :  { %14 = vsyncpa [#allocation4], 0 }
   0x8   :  { %16 = vsyncpa [#allocation4 + $0x1], 0 }
   0x9   :  { %17 = vsyncpa [#allocation7], 0 }
   0xa   :  { %19 = vsyncpa [#allocation7 + $0x1], 0 }
   0xb   :  { %20 = vsyncpa [#allocation10], 0 }
   0xc   :  { %21 = vsyncpa [#allocation5], 0 }
   0xd   :  { %23 = vsyncpa [#allocation5 + $0x1], 0  ;;  %s3225_s30 = smov 0   ;;  %s3227_s10 = smov 0  }
   0xe   :  { %s3229_s11 = smov 0   ;;  %s3231_s12 = smov 0  }
   0xf   :  { %s3233_s13 = smov 0   ;;  %s3235_s14 = smov 0  }
  0x10   :  { %s3237_s15 = smov 0   ;;  %s3239_s16 = smov 0  }
  0x11   :  { %s3241_s17 = smov 0   ;;  %s3243_s18 = smov 0  }
  0x12   :  { %s3245_s19 = smov 0   ;;  %s3247_s20 = smov 0  }
  0x13   :  { %s3249_s21 = smov 0   ;;  %s3251_s22 = smov 0  }
  0x14 LB: > { %4382 = sst [smem:[#allocation23_spill]] %s3098_s10  ;;  %s3296_s23 = sadd.s32 4294967295, %s3146_s22   ;;  %s3146_s22 = sphi %s3251_s22, %s29_s22   ;;  %s3142_s21 = sphi %s3249_s21, %s4467_s21   ;;  %s3138_s20 = sphi %s3247_s20, %s4466_s20   ;;  %s3134_s19 = sphi %s3245_s19, %s4465_s19   ;;  %s3130_s18 = sphi %s3243_s18, %s4464_s18   ;;  %s3126_s17 = sphi %s3241_s17, %s4463_s17   ;;  %s3122_s16 = sphi %s3239_s16, %s4462_s16   ;;  %s3118_s15 = sphi %s3237_s15, %s4461_s15   ;;  %s3114_s14 = sphi %s3235_s14, %s4460_s14   ;;  %s3110_s13 = sphi %s3233_s13, %s4459_s13   ;;  %s3106_s12 = sphi %s3231_s12, %s4449_s12   ;;  %s3102_s11 = sphi %s3229_s11, %s4458_s11   ;;  %s3098_s10 = sphi %s3227_s10, %s4457_s10   ;;  %s3094_s30 = sphi %s3225_s30, %s4456_s30  }
  0x15   : > { %4383 = sst [smem:[#allocation24_spill]] %s3106_s12  ;;  %s38_s25 = sadd.s32 1, %s3138_s20 }
  0x16   : > { %4384 = sst [smem:[#allocation25_spill]] %s3110_s13  ;;  %s41_s26 = sadd.s32 1, %s3142_s21 }
  0x17   : > { %4385 = sst [smem:[#allocation26_spill]] %s3130_s18  ;;  %p39_p0 = scmp.ge.s32.totalorder %s38_s25, 2 }
  0x18   : > { %4386 = sst [smem:[#allocation27_spill]] %s3134_s19  ;;  %s3302_s27 = sshll.u32 %s3138_s20, 3 }
  0x19   : > { %4387 = sst [smem:[#allocation28_spill]] %s3138_s20  ;;  %s2248_s28 = sadd.s32 4294967295, %s3302_s27 }
  0x1a   : > { %4388 = sst [smem:[#allocation29_spill]] %s3296_s23  ;;  %s58_s29 = sadd.s32 1, %s3126_s17 }
  0x1b   : > { %s4469_s25 = smov (%p39_p0, %s38_s25), 0  ;;  %s4471_s26 = smov (!%p39_p0, %s41_s26), %s3142_s21 }
  0x1c   : > { %4389 = sst [smem:[#allocation30_spill]] %s4469_s25  ;;  %p47_p1 = scmp.gt.s32.totalorder %s2248_s28, 0 }
  0x1d   : > { %s2249_s24 = sshll.u32 %s4469_s25, 3  ;;  %p43_p2 = scmp.ge.s32.totalorder %s4471_s26, 2 }
  0x1e   : > { %s2250_s9 = sadd.s32 4294967295, %s2249_s24  ;;  %s4473_s28 = smov (!%p47_p1, %s2248_s28), 0 }
  0x1f   : > { %s4475_s26 = smov (%p43_p2, %s4471_s26), 0  ;;  %p51_p3 = scmp.gt.s32.totalorder %s2250_s9, 0 }
  0x20   : > { %4390 = sst [smem:[#allocation31_spill]] %s4475_s26  ;;  %p65_p4 = scmp.ne.s32.totalorder %s3126_s17, %s3122_s16 }
  0x21   : > { %s3318_s19 = ssub.s32 %s3142_s21, %s4475_s26  ;;  %p66_p5 = scmp.eq.s32.totalorder %s3146_s22, 0 }
  0x22   : > { %s4477_s9 = smov (!%p51_p3, %s2250_s9), 0  ;;  %p71_p7 = scmp.ne.s32.totalorder %s3122_s16, %s3118_s15 }
  0x23   : > { %p3323_p6 = por %p66_p5, %p65_p4  ;;  %s54_s26 = ssub.s32 %s4473_s28, %s4477_s9 }
  0x24   : > { %p4361_p8 = scmp.eq.s32.totalorder %s3296_s23, 0  ;;  %s55_s6 = sor.u32 %s54_s26, %s3318_s19 }
  0x25   : > { %s4391_s8 = scalar_select %p3323_p6, 1, 0 }
  0x26   : > { %s82_s5 = ssub.s32 %s3138_s20, %s4469_s25  ;;  %p56_p9 = scmp.eq.s32.totalorder %s55_s6, 0 }
  0x27   : > { %p3336_p10 = por %p4361_p8, %p71_p7  ;;  %s83_s4 = sor.u32 %s82_s5, %s3318_s19 }
  0x28   : > { %s86_s2 = sadd.s32 1, %s3114_s14  ;;  %p84_p11 = scmp.eq.s32.totalorder %s83_s4, 0 }
  0x29   : > { %s4392_s18 = scalar_select %p3336_p10, 1, 0 }
  0x2a   : > { %s3343_s15 = scalar_select %p56_p9, %s3126_s17, %s58_s29  }
  0x2b   : > { %4393 = sst [smem:[#allocation32_spill]] %s4392_s18  ;;  %p4348_p12 = scmp.ne.s32.totalorder %s3114_s14, %s3110_s13 }
  0x2c   : > { %4394 = sst [smem:[#allocation33_spill]] %s3343_s15  ;;  %p4347_p13 = scmp.ne.s32.totalorder %s3110_s13, %s3106_s12 }
  0x2d   : > { %s2382_s6 = sadd.s32 8, %s3302_s27  ;;  %p3358_p0 = por %p4348_p12, %p66_p5 }
  0x2e   : > { %s3351_s9 = scalar_select %p84_p11, %s3114_s14, %s86_s2  }
  0x2f   : > { %s4396_s5 = scalar_select %p3358_p0, 1, 0 }
  0x30   : > { %4395 = sst [smem:[#allocation34_spill]] %s3351_s9  ;;  %p3367_p1 = por %p4347_p13, %p4361_p8 }
  0x31   : > { %p111_p2 = scmp.lt.s32.totalorder %s2382_s6, 15  ;;  %s2384_s2 = sadd.s32 8, %s2249_s24 }
  0x32   : > { %s4397_s4 = scalar_select %p3367_p1, 1, 0 }
  0x33   : > { %p115_p3 = scmp.lt.s32.totalorder %s2384_s2, 15  ;;  %s122_s26 = sadd.s32 1, %s3102_s11 }
  0x34   : > { %4398 = sst [smem:[#allocation35_spill]] %s4397_s4  ;;  %s4479_s6 = smov (!%p111_p2, %s2382_s6), 15 }
  0x35   : > { %s4481_s2 = smov (!%p115_p3, %s2384_s2), 15  ;;  %p129_p4 = scmp.ne.s32.totalorder %s3102_s11, %s3098_s10 }
  0x36   : > { %p135_p7 = scmp.ne.s32.totalorder %s3098_s10, %s3094_s30  ;;  %s118_s29 = ssub.s32 %s4479_s6, %s4481_s2 }
  0x37   : > { %p287_p9 = scmp.eq.s32.totalorder %s3296_s23, 3  ;;  %s119_s25 = sor.u32 %s118_s29, %s3318_s19 }
  0x38   : > { %p3383_p11 = por %p129_p4, %p66_p5  ;;  %p120_p13 = scmp.eq.s32.totalorder %s119_s25, 0 }
  0x39   : > { %p3389_p12 = por %p135_p7, %p4361_p8  ;;  %p4402_p2 = scmp.ne.s32.totalorder %s3114_s14, %s3110_s13 }
  0x3a   : > { %s4399_s20 = scalar_select %p3383_p11, 1, 0 }
  0x3b   : > { %s4400_s24 = scalar_select %p3389_p12, 1, 0 }
  0x3c   : > { %p3396_p1 = por %p287_p9, %p4402_p2  ;;  %s4405_s30 = sadd.s32 4294967294, %s3146_s22  }
  0x3d   : > { %4401 = sst [smem:[#allocation36_spill]] %s4400_s24  ;;  %p293_p3 = scmp.eq.s32.totalorder %s4405_s30, 3 }
  0x3e   : > { %s4403_s15 = scalar_select %p3396_p1, 1, 0 }
  0x3f   : > { %s3403_s19 = scalar_select %p120_p13, %s3102_s11, %s122_s26  }
  0x40   : > { %4404 = sst [smem:[#allocation37_spill]] %s4403_s15  ;;  %p4407_p5 = scmp.ne.s32.totalorder %s3110_s13, %s3106_s12 }
  0x41   : > { %4406 = sst [smem:[#allocation38_spill]] %s3403_s19  ;;  %p2253_p10 = scmp.ge.s32.totalorder %s3146_s22, 1 }
  0x42   : > { %p3408_p4 = por %p293_p3, %p4407_p5  ;;  %p300_p11 = scmp.lt.s32.totalorder %s3146_s22, 5 }
  0x43   : > { %s3148_s29 = smov [#allocation9]   ;;  %s3149_s30 = smov [#allocation11]  }
  0x44   : > { %s4408_s2 = scalar_select %p3408_p4, 1, 0 }
  0x45   : > { %p3414_p7 = pnand %p2253_p10, %p300_p11  ;;  %s312_s9 = sshll.u32 %s3148_s29, 4  ;;  %s313_s9 = int_to_ptr.vmem [resolvable:$true] %s312_s9 }
  0x46   : > { %4409 = sst [smem:[#allocation39_spill]] %s4408_s2  ;;  %s334_s26 = sshll.u32 %s3149_s30, 4  ;;  %s3426_s26 = int_to_ptr.vmem [resolvable:$true] %s334_s26 }
  0x47   : > { %s4410_s25 = scalar_select %p3414_p7, 1, 0 }
  0x48   : > { %p2531_p9 = pneg %p3414_p7  ;;  %s2904_s15 = scalar_lea.hbm %s4336_s3, 2048 }
  0x49   : > { %p2905_p10 = scmp.ne.s32.totalorder %s4336_s3, %s2904_s15  ;;  %p2911_p5 = scmp.lt.u32.totalorder %s2904_s15, %s4336_s3 }
  0x4a   : > { %p3422_p13 = pnand %p2531_p9, %p4361_p8 }
  0x4c   : > { %p2906_p11 = pneg %p3422_p13 }
  0x4e   : > { %p2907_p2 = pnand %p2906_p11, %p2905_p10 }
  0x50   : > { %p2908_p3 = pneg %p2907_p2 }
  0x52   : > { %p2913_p9 = pnand %p2911_p5, %p2908_p3 }
  0x54   : > { %2916 = shalt.err (!%p2913_p9)
}
  0x55   : > { %s2917_s4 = scalar_lea.vmem %s313_s9, 2048  ;;  %p2925_p12 = scmp.lt.s32.totalorder %s313_s9, %s313_s9 }
  0x56   : > { %p2918_p8 = scmp.ne.s32.totalorder %s313_s9, %s2917_s4  ;;  %p2926_p7 = scmp.lt.s32.totalorder %s2917_s4, %s2917_s4 }
  0x58   : > { %p2920_p4 = pnand %p2918_p8, %p2906_p11  ;;  %p2927_p0 = por %p2926_p7, %p2925_p12 }
  0x5a   : > { %p2921_p1 = pneg %p2920_p4 }
  0x5c   : > { %p2928_p6 = pnand %p2927_p0, %p2921_p1 }
  0x5e   : > { %2931 = shalt.err (!%p2928_p6)
}
  0x5f   : > { %s3150_s12 = smov 128   ;;  %s3151_s24 = smov 8  }
  0x60   : > { %2534 = dma.hbm_to_vmem [thread:$0]  (!%p3422_p13), %s4336_s3, 2048, %s313_s9, [#allocation10], %s3150_s12, %s3150_s12, %s3151_s24  }
  0x61   : > { %s2932_s30 = scalar_lea.hbm %s4340_s7, 1024 }
  0x62   : > { %p2933_p8 = scmp.ne.s32.totalorder %s4340_s7, %s2932_s30  ;;  %p2939_p0 = scmp.lt.u32.totalorder %s2932_s30, %s4340_s7 }
  0x64   : > { %p2935_p6 = pnand %p2933_p8, %p2906_p11 }
  0x66   : > { %p2936_p12 = pneg %p2935_p6 }
  0x68   : > { %p2941_p1 = pnand %p2939_p0, %p2936_p12 }
  0x6a   : > { %2944 = shalt.err (!%p2941_p1)
}
  0x6b   : > { %s2945_s9 = scalar_lea.vmem %s3426_s26, 1024  ;;  %p2953_p2 = scmp.lt.s32.totalorder %s3426_s26, %s3426_s26 }
  0x6c   : > { %p2946_p4 = scmp.ne.s32.totalorder %s3426_s26, %s2945_s9  ;;  %p2954_p3 = scmp.lt.s32.totalorder %s2945_s9, %s2945_s9 }
  0x6e   : > { %p2948_p7 = pnand %p2946_p4, %p2906_p11  ;;  %p2955_p5 = por %p2954_p3, %p2953_p2 }
  0x70   : > { %p2949_p10 = pneg %p2948_p7 }
  0x72   : > { %p2956_p9 = pnand %p2955_p5, %p2949_p10 }
  0x74   : > { %2959 = shalt.err (!%p2956_p9)
}
  0x75   : > { %s3152_s13 = smov 64   ;;  %s3153_s18 = smov 4  }
  0x76   : > { %2537 = dma.hbm_to_vmem [thread:$0]  (!%p3422_p13), %s4340_s7, 1024, %s3426_s26, [#allocation10], %s3152_s13, %s3152_s13, %s3153_s18  }
  0x77   : > { %p2256_p8 = scmp.ge.s32.totalorder %s3146_s22, 4 }
  0x78   : > { %s351_s24 = sand.u32 (!%p2256_p8), 1, %s3126_s17   ;;  %s3478_s10 = sshll.u32 (!%p2256_p8), %s3142_s21, 5 }
  0x79   : > { %347 = sbr.rel (%p2256_p8) target bundleno = 196 (0xc4), region = 40  ;;  %s2257_s15 = sshll.u32 (!%p2256_p8), %s351_s24, 3 }
  0x7a   : > { %s365_s2 = sadd.s32 (!%p2256_p8), %s3478_s10, %s4473_s28  ;;  %s355_s30 = scalar_lea.vmem (!%p2256_p8), [#allocation3], %s2257_s15 }
  0x7b   : > { %s2262_s29 = sshll.u32 (!%p2256_p8), %s365_s2, 6  ;;  %s368_s19 = sshll.u32 (!%p2256_p8), %s355_s30, 4  ;;  %s3487_s19 = int_to_ptr.vmem [resolvable:$true] %s368_s19 }
  0x7c   : > { %s3485_s26 = scalar_lea.hbm (!%p2256_p8), %s4333_s0, %s2262_s29  ;;  %s3489_s13 = scalar_lea.sflag (!%p2256_p8), [#allocation4], %s351_s24 }
  0x7d   : > { %s2960_s18 = scalar_lea.hbm (!%p2256_p8), %s3485_s26, 128  ;;  %p4412_p11 = scmp.ne.s32.totalorder (!%p2256_p8), %s4391_s8, 0 }
  0x7e   : > { %p2961_p13 = scmp.ne.s32.totalorder (!%p2256_p8), %s3485_s26, %s2960_s18  ;;  %s2964_s12 = scalar_lea.hbm (!%p2256_p8), %s4333_s0, 4096 }
  0x7f   : > { %p2965_p0 = scmp.lt.u32.totalorder (!%p2256_p8), %s3485_s26, %s4333_s0  ;;  %p2966_p1 = scmp.lt.u32.totalorder (!%p2256_p8), %s2964_s12, %s2960_s18 }
  0x80   : > { %p2962_p6 = pnand %p2961_p13, %p4412_p11  ;;  %p2968_p7 = scmp.lt.u32.totalorder %s2960_s18, %s3485_s26 }
  0x81   : > { %p2967_p4 = por %p2966_p1, %p2965_p0 }
  0x82   : > { %p2963_p12 = pneg %p2962_p6 }
  0x83   : > { %p2969_p10 = por %p2968_p7, %p2967_p4 }
  0x85   : > { %p2970_p2 = pnand %p2969_p10, %p2963_p12 }
  0x87   : > { %2973 = shalt.err (!%p2970_p2)
}
  0x88   : > { %s2974_s24 = scalar_lea.vmem %s3487_s19, 128  ;;  %s3154_s29 = smov [#allocation3]  }
  0x89   : > { %p2975_p3 = scmp.ne.s32.totalorder %s3487_s19, %s2974_s24  ;;  %s2978_s30 = sshll.u32 %s3154_s29, 4  ;;  %s2979_s30 = int_to_ptr.vmem [resolvable:$false] %s2978_s30 }
  0x8a   : > { %s2980_s4 = scalar_lea.vmem %s2979_s30, 256  ;;  %p2981_p8 = scmp.lt.s32.totalorder %s3487_s19, %s2979_s30 }
  0x8b   : > { %p2976_p5 = pnand %p2975_p3, %p4412_p11  ;;  %p2982_p13 = scmp.lt.s32.totalorder %s2980_s4, %s2974_s24 }
  0x8d   : > { %p2977_p9 = pneg %p2976_p5  ;;  %p2983_p6 = por %p2982_p13, %p2981_p8 }
  0x8f   : > { %p2984_p0 = pnand %p2983_p6, %p2977_p9 }
  0x91   : > { %2987 = shalt.err (!%p2984_p0)
}
  0x92   : > { %s4373_s9 = smov 1024   ;;  %s4374_s18 = smov 64  }
  0x93   : > { %s4375_s28 = smov 4  }
  0x94   : > { %2506 = dma.hbm_to_vmem [thread:$0]  (%p4412_p11), %s3485_s26, 128, %s3487_s19, %s3489_s13, %s4373_s9, %s4374_s18, %s4375_s28  }
  0x95   : > { %s378_s23 = sand.u32 1, %s3146_s22   ;;  %s380_s12 = sand.u32 1, %s3114_s14  }
  0x96   : > { %s2263_s15 = sshll.u32 %s380_s12, 6  ;;  %s389_s2 = sadd.s32 %s3478_s10, %s3302_s27 }
  0x97   : > { %s2267_s24 = sshll.u32 %s389_s2, 6  ;;  %s382_s19 = scalar_lea.vmem [#allocation6], %s2263_s15 }
  0x98   : > { %s391_s30 = scalar_lea.hbm %s4334_s1, %s2267_s24  ;;  %s404_s26 = sshll.u32 %s382_s19, 4  ;;  %s405_s26 = int_to_ptr.vmem [resolvable:$true] %s404_s26 }
  0x99   : > { %p4413_p11 = scmp.ne.s32.totalorder %s4396_s5, 0  ;;  %s3158_s9 = smov 1024  }
  0x9a   : > { %s3159_s18 = smov 512   ;;  %s3160_s27 = smov 8  }
  0x9b   : > { %s2507_s13 = scalar_select %p4413_p11, [#allocation0], [#allocation17] }
  0x9c   : > { %2508 = sst [smem:[#allocation14]] (%p4413_p11), %s3158_s9  ;;  %s3161_s12 = smov 64  }
  0x9d   : > { %s396_s4 = sld [smem:[%s2507_s13]]   ;;  %s3162_s15 = smov 4  }
  0x9e   : > { %2509 = sst [smem:[#allocation14 + $0x1]] (%p4413_p11), %s3159_s18  ;;  %s3537_s8 = scalar_lea.sflag [#allocation7], %s378_s23 }
  0x9f   : > { %2510 = sst [smem:[#allocation14 + $0x2]] (%p4413_p11), %s3160_s27  ;;  %s3163_s9 = smov [#allocation13]  }
  0xa0   : > { %2511 = sst [smem:[#allocation14 + $0x3]] (%p4413_p11), %s3161_s12  ;;  %s429_s18 = sand.u32 1, %s3102_s11  }
  0xa1   : > { %2512 = sst [smem:[#allocation14 + $0x4]] (%p4413_p11), %s3161_s12  ;;  %s441_s29 = sadd.s32 %s3478_s10, %s4479_s6 }
  0xa2   : > { %2513 = sst [smem:[#allocation14 + $0x5]] (%p4413_p11), %s3162_s15  ;;  %s2270_s19 = sshll.u32 %s429_s18, 3 }
  0xa3   : > { %s2268_s2 = sshll.u32 %s396_s4, 26  ;;  %s2274_s13 = sshll.u32 %s441_s29, 6 }
  0xa4   : > { %s2269_s24 = sadd.s32 134217728, %s2268_s2  ;;  %s431_s23 = scalar_lea.vmem [#allocation8], %s2270_s19 }
  0xa5   : > { %2514 = dma.general (%p4413_p11), %s391_s30, 1024, %s405_s26, %s3537_s8, %s3163_s9, [#allocation14], %s2269_s24, 0  }
  0xa6   : > { %s4414_s28 = sld [smem:[#allocation40_spill]]  ;;  %s444_s5 = sshll.u32 %s431_s23, 4  ;;  %s3550_s5 = int_to_ptr.vmem [resolvable:$true] %s444_s5 }
  0xa7   : > { %p4415_p1 = scmp.ne.s32.totalorder %s4399_s20, 0 }
  0xac   : > { %s3548_s15 = scalar_lea.hbm %s4414_s28, %s2274_s13  ;;  %s2992_s26 = scalar_lea.hbm %s4414_s28, 4096 }
  0xad   : > { %s2988_s30 = scalar_lea.hbm %s3548_s15, 128  ;;  %p2993_p10 = scmp.lt.u32.totalorder %s3548_s15, %s4414_s28 }
  0xae   : > { %p2989_p12 = scmp.ne.s32.totalorder %s3548_s15, %s2988_s30  ;;  %p2994_p2 = scmp.lt.u32.totalorder %s2992_s26, %s2988_s30 }
  0xaf   : > { %p2996_p5 = scmp.lt.u32.totalorder %s2988_s30, %s3548_s15 }
  0xb0   : > { %p2990_p4 = pnand %p2989_p12, %p4415_p1  ;;  %p2995_p3 = por %p2994_p2, %p2993_p10 }
  0xb2   : > { %p2991_p7 = pneg %p2990_p4  ;;  %p2997_p9 = por %p2996_p5, %p2995_p3 }
  0xb4   : > { %p2998_p8 = pnand %p2997_p9, %p2991_p7 }
  0xb6   : > { %3001 = shalt.err (!%p2998_p8)
}
  0xb7   : > { %s3002_s24 = scalar_lea.vmem %s3550_s5, 128  ;;  %s3164_s9 = smov [#allocation8]  }
  0xb8   : > { %p3003_p13 = scmp.ne.s32.totalorder %s3550_s5, %s3002_s24  ;;  %s3006_s18 = sshll.u32 %s3164_s9, 4  ;;  %s3007_s18 = int_to_ptr.vmem [resolvable:$false] %s3006_s18 }
  0xb9   : > { %s3008_s29 = scalar_lea.vmem %s3007_s18, 256  ;;  %p3009_p11 = scmp.lt.s32.totalorder %s3550_s5, %s3007_s18 }
  0xba   : > { %p3004_p6 = pnand %p3003_p13, %p4415_p1  ;;  %p3010_p12 = scmp.lt.s32.totalorder %s3008_s29, %s3002_s24 }
  0xbc   : > { %p3005_p0 = pneg %p3004_p6  ;;  %p3011_p4 = por %p3010_p12, %p3009_p11 }
  0xbe   : > { %p3012_p10 = pnand %p3011_p4, %p3005_p0 }
  0xc0   : > { %3015 = shalt.err (!%p3012_p10)
}
  0xc1   : > { %s4416_s19 = smov 4   ;;  %s4417_s13 = smov 64  }
  0xc2   : > { %s4418_s27 = smov 1024  }
  0xc3   : > { %2515 = dma.hbm_to_vmem [thread:$0]  (%p4415_p1), %s3548_s15, 128, %s3550_s5, %s3537_s8, %s4418_s27, %s4417_s13, %s4416_s19  }
  0xc4 PF: > { %p4419_p7 = scmp.ne.s32.totalorder %s4410_s25, 0 }
  0xc5   : > { %s4420_s12 = sld [smem:[#allocation32_spill]] (!%p4419_p7)  ;;  %s458_s23 = sand.u32 (!%p4419_p7), 1, %s3122_s16  }
  0xc6   : > { %456 = sbr.rel (%p4419_p7) target bundleno = 1238 (0x4d6), region = 56  ;;  %s3580_s30 = sshll.u32 (!%p4419_p7), %s458_s23, 3 }
  0xc7   : > { %s459_s6 = scalar_lea.sflag (!%p4419_p7), [#allocation4], %s458_s23  ;;  %s462_s10 = scalar_lea.vmem (!%p4419_p7), [#allocation3], %s3580_s30 }
  0xcb   : > { %p4421_p2 = scmp.ne.s32.totalorder (!%p4419_p7), %s4420_s12, 0 }
  0xcd   : > { %3073 = dma.done.wait (%p4421_p2), %s459_s6, 128  }
  0xce   : > { %3075 = vsyncadd (%p4421_p2), %s459_s6, 4294967168  ;;  %s4422_s20 = sld [smem:[#allocation29_spill]]  ;;  %s4423_s26 = sld [smem:[#allocation25_spill]] }
  0xcf   : > { %s4424_s8 = sld [smem:[#allocation35_spill]] }
  0xd4   : > { %s467_s15 = sand.u32 1, %s4422_s20   ;;  %s469_s25 = sand.u32 1, %s4423_s26  }
  0xd5   : > { %s3591_s5 = sshll.u32 %s469_s25, 6  ;;  %s468_s4 = scalar_lea.sflag [#allocation7], %s467_s15 }
  0xd6   : > { %s3594_s2 = scalar_lea.vmem [#allocation6], %s3591_s5  ;;  %p4425_p1 = scmp.ne.s32.totalorder %s4424_s8, 0 }
  0xd8   : > { %3077 = dma.done.wait (%p4425_p1), %s468_s4, 1024  }
  0xd9   : > { %3079 = vsyncadd (%p4425_p1), %s468_s4, 4294966272  ;;  %s4426_s24 = sld [smem:[#allocation23_spill]]  ;;  %s4427_s9 = sld [smem:[#allocation36_spill]] }
  0xdf   : > { %s478_s18 = sand.u32 1, %s4426_s24   ;;  %p4428_p3 = scmp.ne.s32.totalorder %s4427_s9, 0 }
  0xe0   : > { %s3601_s29 = sshll.u32 %s478_s18, 3 }
  0xe1   : > { %s480_s19 = scalar_lea.vmem [#allocation8], %s3601_s29 }
  0xe2   : > { %3081 = dma.done.wait (%p4428_p3), %s468_s4, 128  }
  0xe3   : > { %3083 = vsyncadd (%p4428_p3), %s468_s4, 4294967168  ;;  %p4429_p5 = scmp.eq.s32.totalorder %s4422_s20, 0 }
  0xe5   : > { %3085 = dma.done.wait (%p4429_p5), [#allocation10], 3072   ;;  %p4430_p9 = pmov %p4429_p5 }
  0xe6   : > { %vm655_vm0 = vcmask 1043456   ;;  %v3612_v0 = vld [vmem:[#allocation11] sm:$0xf]  ;;  %v3614_v1 = vld [vmem:[#allocation11 + $0x4] sm:$0xf]  ;;  %v3648_v18 = vld [vmem:[%s3594_s2 + $0x4] sm:$0xff]  }
  0xe7   : > { %3087 = vsyncadd (%p4430_p9), [#allocation10], 4294964224  ;;  %v3616_v2 = vld [vmem:[#allocation11 + $0x8] sm:$0xf]  ;;  %v3618_v3 = vld [vmem:[#allocation11 + $0xc] sm:$0xf]  ;;  %v674_v21 = vunpack.c.l.bf16 %v3648_v18  ;;  %v675_v23 = vunpack.c.h.bf16 %v3648_v18 }
  0xe8   : > { %v3620_v4 = vld [vmem:[#allocation11 + $0x10] sm:$0xf]  ;;  %v3622_v5 = vld [vmem:[#allocation11 + $0x14] sm:$0xf]  ;;  %v3624_v6 = vld [vmem:[#allocation11 + $0x18] sm:$0xf] }
  0xe9   : > { %v3626_v7 = vld [vmem:[#allocation11 + $0x1c] sm:$0xf]  ;;  %v3628_v8 = vld [vmem:[#allocation11 + $0x20] sm:$0xf]  ;;  %v3630_v9 = vld [vmem:[#allocation11 + $0x24] sm:$0xf]  ;;  %696 = vadd.xlane.f32.xlu1 %v674_v21 }
  0xea   : > { %v3632_v10 = vld [vmem:[#allocation11 + $0x28] sm:$0xf]  ;;  %v3634_v11 = vld [vmem:[#allocation11 + $0x2c] sm:$0xf]  ;;  %v3636_v12 = vld [vmem:[#allocation11 + $0x30] sm:$0xf] }
  0xeb   : > { %v3638_v13 = vld [vmem:[#allocation11 + $0x34] sm:$0xf]  ;;  %v3640_v14 = vld [vmem:[#allocation11 + $0x38] sm:$0xf]  ;;  %v3642_v15 = vld [vmem:[#allocation11 + $0x3c] sm:$0xf] }
  0xec   : > { %v581_v16 = vld [vmem:[%s462_s10] sm:$0xf]  ;;  %v2684_v17 = vld [vmem:[%s3594_s2] ss:$0 sps:$4 sm:$0xff]   ;;  %v2688_v28 = vld [vmem:[%s3594_s2 + $0x1c] ss:$0 sps:$4 sm:$0xff]  }
  0xed   : > { %v3651_v19 = vsel %vm655_vm0, %v581_v16, %v2684_v17  ;;  %v3662_v24 = vld [vmem:[%s3594_s2 + $0xc] sm:$0xff]   ;;  %v3665_v25 = vld [vmem:[%s3594_s2 + $0x14] sm:$0xff]   ;;  %698 = vadd.xlane.f32.xlu1 %v675_v23  ;;  %v2689_v29 = vld [vmem:[%s480_s19] ss:$0 sps:$4 sm:$0xff]   ;;  %s4431_s12 = sld [smem:[#allocation41_spill]]  ;;  %s3997_s23 = scalar_lea.vmem [#allocation12], %s3591_s5 }
  0xee   : > { %v672_v20 = vunpack.c.l.bf16 %v3651_v19  ;;  %v673_v22 = vunpack.c.h.bf16 %v3651_v19  ;;  %v676_v26 = vunpack.c.l.bf16 %v3662_v24  ;;  %v677_v27 = vunpack.c.h.bf16 %v3662_v24  ;;  %v2690_v30 = vld [vmem:[%s3594_s2 + $0x20] ss:$0 sps:$4 sm:$0xff]   ;;  %v582_v34 = vld [vmem:[%s462_s10 + $0x4] sm:$0xf]  ;;  %v3704_v40 = vld [vmem:[%s3594_s2 + $0x24] sm:$0xff]   ;;  %s4432_s30 = sld [smem:[#allocation26_spill]] }
  0xef   : > { %v678_v31 = vunpack.c.l.bf16 %v3665_v25  ;;  %v679_v32 = vunpack.c.h.bf16 %v3665_v25  ;;  %v3684_v33 = vsel %vm655_vm0, %v2688_v28, %v2689_v29  ;;  %v3695_v37 = vsel %vm655_vm0, %v582_v34, %v2690_v30  ;;  %v3713_v43 = vld [vmem:[%s3594_s2 + $0x2c] sm:$0xff]   ;;  %v3722_v46 = vld [vmem:[%s3594_s2 + $0x34] sm:$0xff]   ;;  %v2694_v47 = vld [vmem:[%s3594_s2 + $0x3c] ss:$0 sps:$4 sm:$0xff]  }
  0xf0   : > { %692 = vadd.xlane.f32.xlu0 %v672_v20  ;;  %v680_v35 = vunpack.c.l.bf16 %v3684_v33  ;;  %v681_v36 = vunpack.c.h.bf16 %v3684_v33  ;;  %v682_v38 = vunpack.c.l.bf16 %v3695_v37  ;;  %v683_v39 = vunpack.c.h.bf16 %v3695_v37  ;;  %v2695_v48 = vld [vmem:[%s480_s19 + $0x4] ss:$0 sps:$4 sm:$0xff]   ;;  %v2696_v54 = vld [vmem:[#allocation9 + $0x4] ss:$8 sps:$4 sm:$0xff]   ;;  %v2698_v55 = vld [vmem:[#allocation9] ss:$8 sps:$4 sm:$0xff]  }
  0xf1   : > { %702 = vadd.xlane.f32.xlu1 %v677_v27  ;;  %v684_v41 = vunpack.c.l.bf16 %v3704_v40  ;;  %v685_v42 = vunpack.c.h.bf16 %v3704_v40  ;;  %v686_v44 = vunpack.c.l.bf16 %v3713_v43  ;;  %v687_v45 = vunpack.c.h.bf16 %v3713_v43  ;;  %v2699_v56 = vld [vmem:[#allocation9 + $0x14] ss:$8 sps:$4 sm:$0xff]   ;;  %1014 = vmatprep.subr.bf16.mxu0 %v2696_v54  ;;  %v2701_v57 = vld [vmem:[#allocation9 + $0x10] ss:$8 sps:$4 sm:$0xff]  }
  0xf2   : > { %v688_v49 = vunpack.c.l.bf16 %v3722_v46  ;;  %v689_v50 = vunpack.c.h.bf16 %v3722_v46  ;;  %v3734_v51 = vsel %vm655_vm0, %v2694_v47, %v2695_v48  ;;  %1015 = vmatpush1.bf16.msra.mxu0 %v2698_v55 }
  0xf3   : > { %v690_v52 = vunpack.c.l.bf16 %v3734_v51  ;;  %v691_v53 = vunpack.c.h.bf16 %v3734_v51  ;;  %1016 = vmatprep.subr.bf16.mxu0 %v2699_v56 }
  0xf4   : > { %694 = vadd.xlane.f32.xlu0 %v673_v22  ;;  %p2330_p8 = scmp.ne.s32.totalorder %s4432_s30, 0 }
  0xf5   : > { %706 = vadd.xlane.f32.xlu1 %v679_v32 }
  0xf6   : > { %1017 = vmatpush1.bf16.msra.mxu0 %v2701_v57 }
  0xf8   : > { %700 = vadd.xlane.f32.xlu0 %v676_v26 }
  0xf9   : > { %710 = vadd.xlane.f32.xlu1 %v681_v36 }
  0xfc   : > { %704 = vadd.xlane.f32.xlu0 %v678_v31 }
  0xfd   : > { %714 = vadd.xlane.f32.xlu1 %v683_v39 }
 0x100   : > { %708 = vadd.xlane.f32.xlu0 %v680_v35 }
 0x101   : > { %718 = vadd.xlane.f32.xlu1 %v685_v42 }
 0x104   : > { %712 = vadd.xlane.f32.xlu0 %v682_v38 }
 0x105   : > { %722 = vadd.xlane.f32.xlu1 %v687_v45 }
 0x108   : > { %716 = vadd.xlane.f32.xlu0 %v684_v41 }
 0x109   : > { %726 = vadd.xlane.f32.xlu1 %v689_v50 }
 0x10c   : > { %720 = vadd.xlane.f32.xlu0 %v686_v44 }
 0x10d   : > { %730 = vadd.xlane.f32.xlu1 %v691_v53 }
 0x110   : > { %724 = vadd.xlane.f32.xlu0 %v688_v49 }
 0x114   : > { %728 = vadd.xlane.f32.xlu0 %v690_v52 }
 0x176   : > { %v697_v59 = vpop.xlane.xlu1 %696 }
 0x177   : > { %v735_v61 = vmul.f32 0.0078125, %v697_v59 }
 0x179   : > { %v3752_v63 = vsub.f32 %v674_v21, %v735_v61 }
 0x17a   : > { %v699_v17 = vpop.xlane.xlu1 %698 }
 0x17b   : > { %v736_v30 = vmul.f32 0.0078125, %v699_v17  ;;  %v775_v21 = vmul.f32 %v3752_v63, %v3752_v63 }
 0x17d   : > { %v693_v58 = vpop.xlane.xlu0 %692 }
 0x17e   : > { %v733_v60 = vmul.f32 0.0078125, %v693_v58  ;;  %v703_v48 = vpop.xlane.xlu1 %702 }
 0x17f   : > { %v738_v56 = vmul.f32 0.0078125, %v703_v48 }
 0x180   : > { %v3748_v62 = vsub.f32 %v672_v20, %v733_v60  ;;  %v3762_v20 = vsub.f32 %v675_v23, %v736_v30  ;;  %v2702_v30 = vld [vmem:[#allocation9 + $0x24] ss:$8 sps:$4 sm:$0xff]  }
 0x181   : > { %v695_v16 = vpop.xlane.xlu0 %694  ;;  %v3774_v18 = vsub.f32 %v677_v27, %v738_v56  ;;  %1018 = vmatprep.subr.bf16.mxu0 %v2702_v30 }
 0x182   : > { %v734_v28 = vmul.f32 0.0078125, %v695_v16  ;;  %v773_v29 = vmul.f32 %v3748_v62, %v3748_v62  ;;  %v707_v57 = vpop.xlane.xlu1 %706 }
 0x183   : > { %v740_v60 = vmul.f32 0.0078125, %v707_v57  ;;  %v778_v27 = vmul.f32 %v3774_v18, %v3774_v18 }
 0x184   : > { %v3758_v34 = vsub.f32 %v673_v22, %v734_v28  ;;  %793 = vadd.xlane.f32.xlu0 %v773_v29  ;;  %v776_v22 = vmul.f32 %v3762_v20, %v3762_v20 }
 0x185   : > { %v701_v47 = vpop.xlane.xlu0 %700  ;;  %v3786_v24 = vsub.f32 %v679_v32, %v740_v60 }
 0x186   : > { %v737_v54 = vmul.f32 0.0078125, %v701_v47  ;;  %v774_v55 = vmul.f32 %v3758_v34, %v3758_v34  ;;  %v711_v16 = vpop.xlane.xlu1 %710 }
 0x187   : > { %v742_v29 = vmul.f32 0.0078125, %v711_v16  ;;  %v780_v32 = vmul.f32 %v3786_v24, %v3786_v24 }
 0x188   : > { %v3770_v19 = vsub.f32 %v676_v26, %v737_v54  ;;  %797 = vadd.xlane.f32.xlu0 %v775_v21  ;;  %795 = vadd.xlane.f32.xlu1 %v774_v55  ;;  %v2704_v21 = vld [vmem:[#allocation9 + $0x20] ss:$8 sps:$4 sm:$0xff]  }
 0x189   : > { %v705_v23 = vpop.xlane.xlu0 %704  ;;  %v3798_v25 = vsub.f32 %v681_v36, %v742_v29  ;;  %1019 = vmatpush1.bf16.msra.mxu0 %v2704_v21  ;;  %v2711_v21 = vld [vmem:[#allocation9 + $0x54] ss:$8 sps:$4 sm:$0xff]  }
 0x18a   : > { %v739_v58 = vmul.f32 0.0078125, %v705_v23  ;;  %v777_v59 = vmul.f32 %v3770_v19, %v3770_v19  ;;  %v715_v48 = vpop.xlane.xlu1 %714 }
 0x18b   : > { %v744_v56 = vmul.f32 0.0078125, %v715_v48  ;;  %v782_v36 = vmul.f32 %v3798_v25, %v3798_v25 }
 0x18c   : > { %v3782_v26 = vsub.f32 %v678_v31, %v739_v58  ;;  %799 = vadd.xlane.f32.xlu1 %v776_v22  ;;  %801 = vadd.xlane.f32.xlu0 %v777_v59  ;;  %v2705_v22 = vld [vmem:[#allocation9 + $0x34] ss:$8 sps:$4 sm:$0xff]   ;;  %v2707_v58 = vld [vmem:[#allocation9 + $0x30] ss:$8 sps:$4 sm:$0xff]  }
 0x18d   : > { %v709_v61 = vpop.xlane.xlu0 %708  ;;  %v3810_v33 = vsub.f32 %v683_v39, %v744_v56  ;;  %1020 = vmatprep.subr.bf16.mxu0 %v2705_v22  ;;  %v2714_v22 = vld [vmem:[#allocation9 + $0x64] ss:$8 sps:$4 sm:$0xff]  }
 0x18e   : > { %v741_v17 = vmul.f32 0.0078125, %v709_v61  ;;  %v779_v28 = vmul.f32 %v3782_v26, %v3782_v26  ;;  %v719_v57 = vpop.xlane.xlu1 %718  ;;  %1021 = vmatpush1.bf16.msra.mxu0 %v2707_v58  ;;  %v2708_v61 = vld [vmem:[#allocation9 + $0x44] ss:$8 sps:$4 sm:$0xff]   ;;  %v2716_v58 = vld [vmem:[#allocation9 + $0x60] ss:$8 sps:$4 sm:$0xff]  }
 0x18f   : > { %v784_v39 = vmul.f32 %v3810_v33, %v3810_v33  ;;  %1022 = vmatprep.subr.bf16.mxu0 %v2708_v61  ;;  %v2719_v61 = vld [vmem:[#allocation9 + $0x70] ss:$8 sps:$4 sm:$0xff]  }
 0x190   : > { %v3794_v31 = vsub.f32 %v680_v35, %v741_v17  ;;  %803 = vadd.xlane.f32.xlu1 %v778_v27  ;;  %805 = vadd.xlane.f32.xlu0 %v779_v28  ;;  %v746_v27 = vmul.f32 0.0078125, %v719_v57  ;;  %v2710_v28 = vld [vmem:[#allocation9 + $0x40] ss:$8 sps:$4 sm:$0xff]  }
 0x191   : > { %v713_v47 = vpop.xlane.xlu0 %712 }
 0x192   : > { %v743_v54 = vmul.f32 0.0078125, %v713_v47  ;;  %v781_v55 = vmul.f32 %v3794_v31, %v3794_v31  ;;  %v3822_v37 = vsub.f32 %v685_v42, %v746_v27  ;;  %v723_v17 = vpop.xlane.xlu1 %722  ;;  %1023 = vmatpush1.bf16.msra.mxu0 %v2710_v28 }
 0x193   : > { %1024 = vmatprep.subr.bf16.mxu0 %v2711_v21 }
 0x194   : > { %v3806_v35 = vsub.f32 %v682_v38, %v743_v54  ;;  %807 = vadd.xlane.f32.xlu1 %v780_v32  ;;  %809 = vadd.xlane.f32.xlu0 %v781_v55  ;;  %v748_v32 = vmul.f32 0.0078125, %v723_v17  ;;  %v786_v42 = vmul.f32 %v3822_v37, %v3822_v37  ;;  %v2713_v54 = vld [vmem:[#allocation9 + $0x50] ss:$8 sps:$4 sm:$0xff]   ;;  %v3165_v17 = vmov 0  }
 0x195   : > { %v717_v23 = vpop.xlane.xlu0 %716  ;;  %1046 = vmatprep.mubr.bf16.mxu0 %v3165_v17 }
 0x196   : > { %v745_v59 = vmul.f32 0.0078125, %v717_v23  ;;  %v783_v60 = vmul.f32 %v3806_v35, %v3806_v35  ;;  %v3834_v40 = vsub.f32 %v687_v45, %v748_v32  ;;  %v727_v48 = vpop.xlane.xlu1 %726  ;;  %1025 = vmatpush1.bf16.msra.mxu0 %v2713_v54 }
 0x197   : > { %1026 = vmatprep.subr.bf16.mxu0 %v2714_v22 }
 0x198   : > { %v3818_v38 = vsub.f32 %v684_v41, %v745_v59  ;;  %811 = vadd.xlane.f32.xlu1 %v782_v36  ;;  %813 = vadd.xlane.f32.xlu0 %v783_v60  ;;  %v750_v36 = vmul.f32 0.0078125, %v727_v48  ;;  %v788_v45 = vmul.f32 %v3834_v40, %v3834_v40 }
 0x199   : > { %v721_v16 = vpop.xlane.xlu0 %720 }
 0x19a   : > { %v747_v29 = vmul.f32 0.0078125, %v721_v16  ;;  %v785_v30 = vmul.f32 %v3818_v38, %v3818_v38  ;;  %v3846_v43 = vsub.f32 %v689_v50, %v750_v36  ;;  %v731_v57 = vpop.xlane.xlu1 %730  ;;  %1027 = vmatpush1.bf16.msra.mxu0 %v2716_v58 }
 0x19b   : > { %v752_v27 = vmul.f32 0.0078125, %v731_v57 }
 0x19c   : > { %v3830_v41 = vsub.f32 %v686_v44, %v747_v29  ;;  %815 = vadd.xlane.f32.xlu1 %v784_v39  ;;  %817 = vadd.xlane.f32.xlu0 %v785_v30  ;;  %v790_v50 = vmul.f32 %v3846_v43, %v3846_v43  ;;  %v2717_v39 = vld [vmem:[#allocation9 + $0x74] ss:$8 sps:$4 sm:$0xff]  }
 0x19d   : > { %v725_v47 = vpop.xlane.xlu0 %724  ;;  %v3858_v46 = vsub.f32 %v691_v53, %v752_v27  ;;  %1028 = vmatprep.subr.bf16.mxu0 %v2717_v39 }
 0x19e   : > { %v749_v55 = vmul.f32 0.0078125, %v725_v47  ;;  %v787_v56 = vmul.f32 %v3830_v41, %v3830_v41  ;;  %1029 = vmatpush1.bf16.msra.mxu0 %v2719_v61 }
 0x1a0   : > { %v3842_v44 = vsub.f32 %v688_v49, %v749_v55  ;;  %819 = vadd.xlane.f32.xlu1 %v786_v42  ;;  %821 = vadd.xlane.f32.xlu0 %v787_v56 }
 0x1a1   : > { %v729_v23 = vpop.xlane.xlu0 %728 }
 0x1a2   : > { %v751_v59 = vmul.f32 0.0078125, %v729_v23  ;;  %v789_v60 = vmul.f32 %v3842_v44, %v3842_v44 }
 0x1a4   : > { %v3854_v49 = vsub.f32 %v690_v52, %v751_v59  ;;  %823 = vadd.xlane.f32.xlu1 %v788_v45  ;;  %825 = vadd.xlane.f32.xlu0 %v789_v60  ;;  %v792_v52 = vmul.f32 %v3858_v46, %v3858_v46 }
 0x1a6   : > { %v791_v16 = vmul.f32 %v3854_v49, %v3854_v49 }
 0x1a8   : > { %827 = vadd.xlane.f32.xlu1 %v790_v50  ;;  %829 = vadd.xlane.f32.xlu0 %v791_v16 }
 0x1ac   : > { %831 = vadd.xlane.f32.xlu1 %v792_v52 }
 0x211   : > { %v794_v51 = vpop.xlane.xlu0 %793 }
 0x212   : > { %v833_v53 = vmul.f32 0.0078125, %v794_v51 }
 0x214   : > { %v853_v28 = vadd.f32 1e-05, %v833_v53 }
 0x215   : > { %v796_v29 = vpop.xlane.xlu1 %795  ;;  %v798_v30 = vpop.xlane.xlu0 %797 }
 0x216   : > { %v834_v32 = vmul.f32 0.0078125, %v796_v29  ;;  %2720 = vrsqrt.f32 %v853_v28  ;;  %v835_v21 = vmul.f32 0.0078125, %v798_v30 }
 0x218   : > { %v854_v42 = vadd.f32 1e-05, %v834_v32  ;;  %v855_v54 = vadd.f32 1e-05, %v835_v21 }
 0x219   : > { %v800_v47 = vpop.xlane.xlu1 %799  ;;  %v802_v56 = vpop.xlane.xlu0 %801 }
 0x21a   : > { %2722 = vrsqrt.f32 %v854_v42  ;;  %v836_v48 = vmul.f32 0.0078125, %v800_v47  ;;  %v837_v22 = vmul.f32 0.0078125, %v802_v56 }
 0x21c   : > { %v856_v55 = vadd.f32 1e-05, %v836_v48  ;;  %v857_v60 = vadd.f32 1e-05, %v837_v22 }
 0x21d   : > { %v804_v36 = vpop.xlane.xlu1 %803  ;;  %v806_v27 = vpop.xlane.xlu0 %805 }
 0x21e   : > { %2724 = vrsqrt.f32 %v856_v55  ;;  %v838_v45 = vmul.f32 0.0078125, %v804_v36  ;;  %v839_v51 = vmul.f32 0.0078125, %v806_v27 }
 0x21f   : > { %2726 = vrsqrt.f32 %v855_v54 }
 0x220   : > { %v2721_v23 = vpop.eup %2720  ;;  %v858_v57 = vadd.f32 1e-05, %v838_v45  ;;  %v859_v32 = vadd.f32 1e-05, %v839_v51 }
 0x221   : > { %v808_v58 = vpop.xlane.xlu1 %807  ;;  %v893_v50 = vmul.f32 %v2721_v23, %v3748_v62  ;;  %v810_v42 = vpop.xlane.xlu0 %809 }
 0x222   : > { %2728 = vrsqrt.f32 %v858_v57  ;;  %v840_v61 = vmul.f32 0.0078125, %v808_v58  ;;  %v841_v48 = vmul.f32 0.0078125, %v810_v42 }
 0x223   : > { %2730 = vrsqrt.f32 %v857_v60 }
 0x224   : > { %v2723_v59 = vpop.eup %2722  ;;  %v860_v28 = vadd.f32 1e-05, %v840_v61  ;;  %v861_v45 = vadd.f32 1e-05, %v841_v48 }
 0x225   : > { %v894_v39 = vmul.f32 %v2723_v59, %v3758_v34  ;;  %v812_v29 = vpop.xlane.xlu1 %811 }
 0x226   : > { %2732 = vrsqrt.f32 %v860_v28  ;;  %v842_v34 = vmul.f32 0.0078125, %v812_v29 }
 0x227   : > { %v913_v16 = vpack.c.bf16 %v894_v39, %v893_v50  ;;  %2734 = vrsqrt.f32 %v859_v32 }
 0x228   : > { %v2725_v52 = vpop.eup %2724  ;;  %v862_v55 = vadd.f32 1e-05, %v842_v34 }
 0x229   : > { %1047 = vmatmul.mubr.bf16.vlgmr.msra.gmra.mrb[0].mxu0 %v913_v16  ;;  %v2727_v53 = vpop.eup %2726  ;;  %v896_v30 = vmul.f32 %v2725_v52, %v3762_v20  ;;  %v816_v56 = vpop.xlane.xlu1 %815 }
 0x22a   : > { %1056 = vmatprep.mubr.bf16.mxu0 %v3165_v17  ;;  %v895_v62 = vmul.f32 %v2727_v53, %v3752_v63  ;;  %v814_v20 = vpop.xlane.xlu0 %813  ;;  %2736 = vrsqrt.f32 %v862_v55  ;;  %v844_v63 = vmul.f32 0.0078125, %v816_v56 }
 0x22b   : > { %2738 = vrsqrt.f32 %v861_v45  ;;  %v843_v58 = vmul.f32 0.0078125, %v814_v20 }
 0x22c   : > { %v914_v21 = vpack.c.bf16 %v896_v30, %v895_v62  ;;  %v2729_v47 = vpop.eup %2728  ;;  %v864_v60 = vadd.f32 1e-05, %v844_v63 }
 0x22d   : > { %v2731_v54 = vpop.eup %2730  ;;  %v898_v36 = vmul.f32 %v2729_v47, %v3774_v18  ;;  %v820_v27 = vpop.xlane.xlu1 %819  ;;  %v863_v39 = vadd.f32 1e-05, %v843_v58 }
 0x22e   : > { %v897_v22 = vmul.f32 %v2731_v54, %v3770_v19  ;;  %v818_v18 = vpop.xlane.xlu0 %817  ;;  %2740 = vrsqrt.f32 %v864_v60  ;;  %v846_v19 = vmul.f32 0.0078125, %v820_v27 }
 0x22f   : > { %2742 = vrsqrt.f32 %v863_v39  ;;  %v845_v51 = vmul.f32 0.0078125, %v818_v18 }
 0x230   : > { %v915_v23 = vpack.c.bf16 %v898_v36, %v897_v22  ;;  %v2733_v57 = vpop.eup %2732  ;;  %v866_v28 = vadd.f32 1e-05, %v846_v19 }
 0x231   : > { %1057 = vmatmul.mubr.bf16.gmra.mrb[4].mxu0 %v914_v21  ;;  %v2735_v59 = vpop.eup %2734  ;;  %v900_v50 = vmul.f32 %v2733_v57, %v3786_v24  ;;  %v824_v29 = vpop.xlane.xlu1 %823  ;;  %v865_v32 = vadd.f32 1e-05, %v845_v51 }
 0x232   : > { %1066 = vmatprep.mubr.bf16.mxu0 %v3165_v17  ;;  %v899_v61 = vmul.f32 %v2735_v59, %v3782_v26  ;;  %v822_v24 = vpop.xlane.xlu0 %821  ;;  %2744 = vrsqrt.f32 %v866_v28  ;;  %v848_v26 = vmul.f32 0.0078125, %v824_v29 }
 0x233   : > { %2746 = vrsqrt.f32 %v865_v32  ;;  %v847_v21 = vmul.f32 0.0078125, %v822_v24 }
 0x234   : > { %v916_v16 = vpack.c.bf16 %v900_v50, %v899_v61  ;;  %v2737_v52 = vpop.eup %2736  ;;  %v868_v48 = vadd.f32 1e-05, %v848_v26 }
 0x235   : > { %v2739_v53 = vpop.eup %2738  ;;  %v902_v30 = vmul.f32 %v2737_v52, %v3798_v25  ;;  %v828_v54 = vpop.xlane.xlu1 %827  ;;  %v867_v56 = vadd.f32 1e-05, %v847_v21 }
 0x236   : > { %v901_v42 = vmul.f32 %v2739_v53, %v3794_v31  ;;  %v826_v25 = vpop.xlane.xlu0 %825  ;;  %2748 = vrsqrt.f32 %v868_v48  ;;  %v850_v31 = vmul.f32 0.0078125, %v828_v54 }
 0x237   : > { %2750 = vrsqrt.f32 %v867_v56  ;;  %v849_v22 = vmul.f32 0.0078125, %v826_v25 }
 0x238   : > { %v917_v62 = vpack.c.bf16 %v902_v30, %v901_v42  ;;  %v2741_v34 = vpop.eup %2740  ;;  %v924_v42 = vlaneseq }
 0x239   : > { %1067 = vmatmul.mubr.bf16.gmra.mrb[8].mxu0 %v915_v23  ;;  %v2743_v47 = vpop.eup %2742  ;;  %v904_v55 = vmul.f32 %v2741_v34, %v3810_v33  ;;  %v870_v23 = vadd.f32 1e-05, %v850_v31  ;;  %v832_v57 = vpop.xlane.xlu1 %831  ;;  %v869_v59 = vadd.f32 1e-05, %v849_v22 }
 0x23a   : > { %1076 = vmatprep.mubr.bf16.mxu0 %v3165_v17  ;;  %v903_v36 = vmul.f32 %v2743_v47, %v3806_v35  ;;  %v830_v33 = vpop.xlane.xlu0 %829  ;;  %v852_v35 = vmul.f32 0.0078125, %v832_v57  ;;  %v3896_v26 = vshrl.u32 %v924_v42, 7 }
 0x23b   : > { %2752 = vrsqrt.f32 %v870_v23  ;;  %v851_v39 = vmul.f32 0.0078125, %v830_v33 }
 0x23c   : > { %v918_v45 = vpack.c.bf16 %v904_v55, %v903_v36  ;;  %v2745_v20 = vpop.eup %2744  ;;  %2754 = vrsqrt.f32 %v869_v59  ;;  %v872_v61 = vadd.f32 1e-05, %v852_v35 }
 0x23d   : > { %v2747_v63 = vpop.eup %2746  ;;  %v906_v58 = vmul.f32 %v2745_v20, %v3822_v37 }
 0x23e   : > { %v905_v60 = vmul.f32 %v2747_v63, %v3818_v38  ;;  %2756 = vrsqrt.f32 %v872_v61 }
 0x240   : > { %v919_v27 = vpack.c.bf16 %v906_v58, %v905_v60  ;;  %v2749_v50 = vpop.eup %2748 }
 0x241   : > { %1077 = vmatmul.mubr.bf16.gmra.mrb[12].mxu0 %v916_v16  ;;  %v2751_v18 = vpop.eup %2750  ;;  %v908_v19 = vmul.f32 %v2749_v50, %v3834_v40  ;;  %v871_v16 = vadd.f32 1e-05, %v851_v39  ;;  %v926_v50 = vsub.s32 0, %v3896_v26 }
 0x242   : > { %1086 = vmatprep.mubr.bf16.mxu0 %v3165_v17  ;;  %v907_v37 = vmul.f32 %v2751_v18, %v3830_v41 }
 0x243   : > { %2758 = vrsqrt.f32 %v871_v16 }
 0x244   : > { %v920_v52 = vpack.c.bf16 %v908_v19, %v907_v37 }
 0x245   : > { %v2753_v51 = vpop.eup %2752 }
 0x246   : > { %v2755_v38 = vpop.eup %2754  ;;  %v910_v53 = vmul.f32 %v2753_v51, %v3846_v43 }
 0x247   : > { %v909_v28 = vmul.f32 %v2755_v38, %v3842_v44  ;;  %v564_v44 = vld [vmem:[%s4431_s12] sm:$0x3] }
 0x248   : > { %v2757_v30 = vpop.eup %2756  ;;  %v3921_v16 = vrot.slane %v564_v44, %v926_v50 }
 0x249   : > { %1087 = vmatmul.mubr.bf16.gmra.mrb[16].mxu0 %v917_v62  ;;  %v921_v29 = vpack.c.bf16 %v910_v53, %v909_v28  ;;  %v912_v41 = vmul.f32 %v2757_v30, %v3858_v46  ;;  %v930_v62 = vsub.s32 1, %v3896_v26 }
 0x24a   : > { %1096 = vmatprep.mubr.bf16.mxu0 %v3165_v17 }
 0x24b   : > { %v3904_v43 = vrot.slane %v564_v44, %v930_v62 }
 0x24d   : > { %v2759_v32 = vpop.eup %2758 }
 0x24e   : > { %v911_v40 = vmul.f32 %v2759_v32, %v3854_v49 }
 0x250   : > { %v922_v24 = vpack.c.bf16 %v912_v41, %v911_v40 }
 0x251   : > { %1097 = vmatmul.mubr.bf16.gmra.mrb[20].mxu0 %v918_v45 }
 0x252   : > { %1106 = vmatprep.mubr.bf16.mxu0 %v3165_v17 }
 0x259   : > { %1107 = vmatmul.mubr.bf16.gmra.mrb[24].mxu0 %v919_v27 }
 0x25a   : > { %1116 = vmatprep.mubr.bf16.mxu0 %v3165_v17 }
 0x261   : > { %1117 = vmatmul.mubr.bf16.gmra.mrb[28].mxu0 %v920_v52 }
 0x262   : > { %1126 = vmatprep.mubr.bf16.mxu0 %v3165_v17 }
 0x269   : > { %1127 = vmatmul.mubr.bf16.gmra.mrb[32].mxu0 %v921_v29 }
 0x26a   : > { %1136 = vmatprep.mubr.bf16.mxu0 %v3165_v17 }
 0x271   : > { %1137 = vmatmul.mubr.bf16.gmra.mrb[36].mxu0 %v922_v24 }
 0x2fc   : > { %v1048_v17 = vpop.f32.mrb[0].mxu0 }
 0x2fd   : > { %v1050_v34 = vpop.f32.mrb[1].mxu0  ;;  %v1049_v32 = vadd.f32 %v1048_v17, %v3921_v16 }
 0x2fe   : > { %v1051_v46 = vadd.f32 %v1050_v34, %v3904_v43  ;;  %v1052_v49 = vpop.f32.mrb[2].mxu0 }
 0x2ff   : > { %v1054_v21 = vpop.f32.mrb[3].mxu0  ;;  %v1053_v44 = vadd.f32 %v1052_v49, %v3921_v16 }
 0x300   : > { %v2310_v47 = vmul.f32 -1.442695, %v1051_v46  ;;  %v1055_v48 = vadd.f32 %v1054_v21, %v3904_v43 }
 0x302   : > { %2760 = vpow2.f32 %v2310_v47  ;;  %v2311_v54 = vmul.f32 -1.442695, %v1055_v48 }
 0x304   : > { %2762 = vpow2.f32 %v2311_v54  ;;  %v1058_v55 = vpop.f32.mrb[4].mxu0 }
 0x305   : > { %v1060_v56 = vpop.f32.mrb[5].mxu0 }
 0x306   : > { %v1061_v25 = vadd.f32 %v1060_v56, %v3904_v43  ;;  %v3909_v36 = vpop.f32.mrb[6].mxu0 }
 0x307   : > { %v1064_v31 = vpop.f32.mrb[7].mxu0 }
 0x308   : > { %v2312_v45 = vmul.f32 -1.442695, %v1061_v25  ;;  %v1065_v20 = vadd.f32 %v1064_v31, %v3904_v43 }
 0x30a   : > { %2764 = vpow2.f32 %v2312_v45  ;;  %v2313_v22 = vmul.f32 -1.442695, %v1065_v20  ;;  %v1059_v20 = vadd.f32 %v1058_v55, %v3921_v16 }
 0x30c   : > { %v2761_v63 = vpop.eup %2760  ;;  %2766 = vpow2.f32 %v2313_v22  ;;  %v3912_v23 = vpop.f32.mrb[8].mxu0 }
 0x30d   : > { %v1207_v57 = vadd.f32 1.0, %v2761_v63  ;;  %v1070_v58 = vpop.f32.mrb[9].mxu0 }
 0x30e   : > { %v2763_v59 = vpop.eup %2762  ;;  %v1071_v33 = vadd.f32 %v1070_v58, %v3904_v43  ;;  %v3915_v60 = vpop.f32.mrb[10].mxu0 }
 0x30f   : > { %2768 = vrcp.f32 %v1207_v57  ;;  %v1208_v35 = vadd.f32 1.0, %v2763_v59  ;;  %v1074_v27 = vpop.f32.mrb[11].mxu0  ;;  %v1063_v59 = vadd.f32 %v3909_v36, %v3921_v16 }
 0x310   : > { %v2314_v39 = vmul.f32 -1.442695, %v1071_v33  ;;  %v1075_v18 = vadd.f32 %v1074_v27, %v3904_v43 }
 0x311   : > { %2770 = vrcp.f32 %v1208_v35 }
 0x312   : > { %2772 = vpow2.f32 %v2314_v39  ;;  %v2315_v61 = vmul.f32 -1.442695, %v1075_v18 }
 0x314   : > { %v2765_v19 = vpop.eup %2764  ;;  %2774 = vpow2.f32 %v2315_v61  ;;  %v3923_v37 = vpop.f32.mrb[12].mxu0 }
 0x315   : > { %v1209_v52 = vadd.f32 1.0, %v2765_v19  ;;  %v1080_v51 = vpop.f32.mrb[13].mxu0 }
 0x316   : > { %v2767_v38 = vpop.eup %2766  ;;  %v1081_v53 = vadd.f32 %v1080_v51, %v3904_v43  ;;  %v3926_v28 = vpop.f32.mrb[14].mxu0 }
 0x317   : > { %2776 = vrcp.f32 %v1209_v52  ;;  %v1210_v29 = vadd.f32 1.0, %v2767_v38  ;;  %v1084_v30 = vpop.f32.mrb[15].mxu0 }
 0x318   : > { %v2316_v41 = vmul.f32 -1.442695, %v1081_v53  ;;  %v1085_v40 = vadd.f32 %v1084_v30, %v3904_v43  ;;  %v1069_v53 = vadd.f32 %v3912_v23, %v3921_v16 }
 0x319   : > { %v2769_v24 = vpop.eup %2768  ;;  %2778 = vrcp.f32 %v1210_v29 }
 0x31a   : > { %v1267_v42 = vmul.f32 %v2769_v24, %v1049_v32  ;;  %2780 = vpow2.f32 %v2316_v41  ;;  %v2317_v34 = vmul.f32 -1.442695, %v1085_v40  ;;  %v1073_v40 = vadd.f32 %v3915_v60, %v3921_v16 }
 0x31b   : > { %v2771_v46 = vpop.eup %2770 }
 0x31c   : > { %v2773_v21 = vpop.eup %2772  ;;  %1287 = vst [vmem:[#allocation2] sm:$0xff] %v1267_v42  ;;  %v1268_v47 = vmul.f32 %v2771_v46, %v1053_v44  ;;  %2782 = vpow2.f32 %v2317_v34  ;;  %v3931_v48 = vpop.f32.mrb[16].mxu0 }
 0x31d   : > { %v1211_v54 = vadd.f32 1.0, %v2773_v21  ;;  %v1090_v56 = vpop.f32.mrb[17].mxu0 }
 0x31e   : > { %v2775_v17 = vpop.eup %2774  ;;  %1288 = vst [vmem:[#allocation2 + $0x8] sm:$0xff] %v1268_v47  ;;  %v1091_v25 = vadd.f32 %v1090_v56, %v3904_v43  ;;  %v3934_v31 = vpop.f32.mrb[18].mxu0 }
 0x31f   : > { %2784 = vrcp.f32 %v1211_v54  ;;  %v1212_v45 = vadd.f32 1.0, %v2775_v17  ;;  %v1094_v49 = vpop.f32.mrb[19].mxu0 }
 0x320   : > { %v2318_v22 = vmul.f32 -1.442695, %v1091_v25  ;;  %v1095_v63 = vadd.f32 %v1094_v49, %v3904_v43  ;;  %v1079_v25 = vadd.f32 %v3923_v37, %v3921_v16 }
 0x321   : > { %v2777_v57 = vpop.eup %2776  ;;  %2786 = vrcp.f32 %v1212_v45 }
 0x322   : > { %v1269_v58 = vmul.f32 %v2777_v57, %v1059_v20  ;;  %2788 = vpow2.f32 %v2318_v22  ;;  %v2319_v33 = vmul.f32 -1.442695, %v1095_v63  ;;  %v1083_v63 = vadd.f32 %v3926_v28, %v3921_v16 }
 0x323   : > { %v2779_v35 = vpop.eup %2778 }
 0x324   : > { %v2781_v27 = vpop.eup %2780  ;;  %1289 = vst [vmem:[#allocation2 + $0x10] sm:$0xff] %v1269_v58  ;;  %v1270_v39 = vmul.f32 %v2779_v35, %v1063_v59  ;;  %2790 = vpow2.f32 %v2319_v33  ;;  %v3940_v18 = vpop.f32.mrb[20].mxu0 }
 0x325   : > { %v1213_v61 = vadd.f32 1.0, %v2781_v27  ;;  %v1100_v55 = vpop.f32.mrb[21].mxu0 }
 0x326   : > { %v2783_v19 = vpop.eup %2782  ;;  %1290 = vst [vmem:[#allocation2 + $0x18] sm:$0xff] %v1270_v39  ;;  %v1101_v52 = vadd.f32 %v1100_v55, %v3904_v43  ;;  %v3943_v51 = vpop.f32.mrb[22].mxu0 }
 0x327   : > { %2792 = vrcp.f32 %v1213_v61  ;;  %v1214_v38 = vadd.f32 1.0, %v2783_v19  ;;  %v1104_v36 = vpop.f32.mrb[23].mxu0 }
 0x328   : > { %v2320_v29 = vmul.f32 -1.442695, %v1101_v52  ;;  %v1105_v30 = vadd.f32 %v1104_v36, %v3904_v43  ;;  %v1089_v52 = vadd.f32 %v3931_v48, %v3921_v16 }
 0x329   : > { %v2785_v32 = vpop.eup %2784  ;;  %2794 = vrcp.f32 %v1214_v38 }
 0x32a   : > { %v1271_v41 = vmul.f32 %v2785_v32, %v1069_v53  ;;  %2796 = vpow2.f32 %v2320_v29  ;;  %v2321_v24 = vmul.f32 -1.442695, %v1105_v30  ;;  %v1093_v30 = vadd.f32 %v3934_v31, %v3921_v16 }
 0x32b   : > { %v2787_v42 = vpop.eup %2786 }
 0x32c   : > { %v2789_v44 = vpop.eup %2788  ;;  %1291 = vst [vmem:[#allocation2 + $0x20] sm:$0xff] %v1271_v41  ;;  %v1272_v34 = vmul.f32 %v2787_v42, %v1073_v40  ;;  %2798 = vpow2.f32 %v2321_v24  ;;  %v3950_v46 = vpop.f32.mrb[24].mxu0 }
 0x32d   : > { %v1215_v21 = vadd.f32 1.0, %v2789_v44  ;;  %v1110_v23 = vpop.f32.mrb[25].mxu0 }
 0x32e   : > { %v2791_v47 = vpop.eup %2790  ;;  %1292 = vst [vmem:[#allocation2 + $0x28] sm:$0xff] %v1272_v34  ;;  %v1111_v54 = vadd.f32 %v1110_v23, %v3904_v43  ;;  %v3953_v56 = vpop.f32.mrb[26].mxu0 }
 0x32f   : > { %2800 = vrcp.f32 %v1215_v21  ;;  %v1216_v17 = vadd.f32 1.0, %v2791_v47  ;;  %v1114_v60 = vpop.f32.mrb[27].mxu0 }
 0x330   : > { %v2322_v45 = vmul.f32 -1.442695, %v1111_v54  ;;  %v1115_v49 = vadd.f32 %v1114_v60, %v3904_v43  ;;  %v1099_v54 = vadd.f32 %v3940_v18, %v3921_v16 }
 0x331   : > { %v2793_v20 = vpop.eup %2792  ;;  %2802 = vrcp.f32 %v1216_v17 }
 0x332   : > { %v1273_v22 = vmul.f32 %v2793_v20, %v1079_v25  ;;  %2804 = vpow2.f32 %v2322_v45  ;;  %v2323_v57 = vmul.f32 -1.442695, %v1115_v49  ;;  %v1103_v49 = vadd.f32 %v3943_v51, %v3921_v16 }
 0x333   : > { %v2795_v58 = vpop.eup %2794  ;;  %v1109_v51 = vadd.f32 %v3950_v46, %v3921_v16 }
 0x334   : > { %v2797_v59 = vpop.eup %2796  ;;  %1293 = vst [vmem:[#allocation2 + $0x30] sm:$0xff] %v1273_v22  ;;  %v1274_v33 = vmul.f32 %v2795_v58, %v1083_v63  ;;  %2806 = vpow2.f32 %v2323_v57  ;;  %v3960_v35 = vpop.f32.mrb[28].mxu0 }
 0x335   : > { %v1217_v27 = vadd.f32 1.0, %v2797_v59  ;;  %v1120_v37 = vpop.f32.mrb[29].mxu0 }
 0x336   : > { %v2799_v39 = vpop.eup %2798  ;;  %1294 = vst [vmem:[#allocation2 + $0x38] sm:$0xff] %v1274_v33  ;;  %v1121_v61 = vadd.f32 %v1120_v37, %v3904_v43  ;;  %v3963_v55 = vpop.f32.mrb[30].mxu0 }
 0x337   : > { %2808 = vrcp.f32 %v1217_v27  ;;  %v1218_v19 = vadd.f32 1.0, %v2799_v39  ;;  %v1124_v28 = vpop.f32.mrb[31].mxu0 }
 0x338   : > { %v2324_v38 = vmul.f32 -1.442695, %v1121_v61  ;;  %v1125_v36 = vadd.f32 %v1124_v28, %v3904_v43 }
 0x339   : > { %v2801_v53 = vpop.eup %2800  ;;  %2810 = vrcp.f32 %v1218_v19 }
 0x33a   : > { %v1275_v29 = vmul.f32 %v2801_v53, %v1089_v52  ;;  %2812 = vpow2.f32 %v2324_v38  ;;  %v2325_v32 = vmul.f32 -1.442695, %v1125_v36  ;;  %v1113_v36 = vadd.f32 %v3953_v56, %v3921_v16 }
 0x33b   : > { %v2803_v41 = vpop.eup %2802  ;;  %v1123_v56 = vadd.f32 %v3963_v55, %v3921_v16 }
 0x33c   : > { %v2805_v40 = vpop.eup %2804  ;;  %1295 = vst [vmem:[#allocation2 + $0x40] sm:$0xff] %v1275_v29  ;;  %v1276_v24 = vmul.f32 %v2803_v41, %v1093_v30  ;;  %2814 = vpow2.f32 %v2325_v32  ;;  %v3970_v42 = vpop.f32.mrb[32].mxu0 }
 0x33d   : > { %v1219_v44 = vadd.f32 1.0, %v2805_v40  ;;  %v1130_v48 = vpop.f32.mrb[33].mxu0 }
 0x33e   : > { %v2807_v34 = vpop.eup %2806  ;;  %1296 = vst [vmem:[#allocation2 + $0x48] sm:$0xff] %v1276_v24  ;;  %v1131_v21 = vadd.f32 %v1130_v48, %v3904_v43  ;;  %v3973_v23 = vpop.f32.mrb[34].mxu0 }
 0x33f   : > { %2816 = vrcp.f32 %v1219_v44  ;;  %v1220_v47 = vadd.f32 1.0, %v2807_v34  ;;  %v1134_v31 = vpop.f32.mrb[35].mxu0 }
 0x340   : > { %v2326_v17 = vmul.f32 -1.442695, %v1131_v21  ;;  %v1135_v60 = vadd.f32 %v1134_v31, %v3904_v43 }
 0x341   : > { %v2809_v25 = vpop.eup %2808  ;;  %2818 = vrcp.f32 %v1220_v47 }
 0x342   : > { %v1277_v45 = vmul.f32 %v2809_v25, %v1099_v54  ;;  %2820 = vpow2.f32 %v2326_v17  ;;  %v2327_v20 = vmul.f32 -1.442695, %v1135_v60  ;;  %v1129_v17 = vadd.f32 %v3970_v42, %v3921_v16 }
 0x343   : > { %v2811_v22 = vpop.eup %2810  ;;  %v1133_v25 = vadd.f32 %v3973_v23, %v3921_v16  ;;  %v3166_v23 = vmov (!%p2330_p8), 0.0  }
 0x344   : > { %v2813_v63 = vpop.eup %2812  ;;  %1297 = vst [vmem:[#allocation2 + $0x50] sm:$0xff] %v1277_v45  ;;  %v1278_v57 = vmul.f32 %v2811_v22, %v1103_v49  ;;  %2822 = vpow2.f32 %v2327_v20  ;;  %v1138_v58 = vpop.f32.mrb[36].mxu0  ;;  %1311 = vst [vmem:[#allocation2] sm:$0xff] (!%p2330_p8), %v3166_v23 }
 0x345   : > { %v1221_v59 = vadd.f32 1.0, %v2813_v63  ;;  %v1140_v33 = vpop.f32.mrb[37].mxu0  ;;  %v1139_v49 = vadd.f32 %v1138_v58, %v3921_v16  ;;  %1312 = vst [vmem:[#allocation2 + $0x50] sm:$0xff] (!%p2330_p8), %v3166_v23 }
 0x346   : > { %v2815_v18 = vpop.eup %2814  ;;  %1298 = vst [vmem:[#allocation2 + $0x58] sm:$0xff] %v1278_v57  ;;  %v1141_v27 = vadd.f32 %v1140_v33, %v3904_v43  ;;  %v1142_v37 = vpop.f32.mrb[38].mxu0 }
 0x347   : > { %2824 = vrcp.f32 %v1221_v59  ;;  %v1222_v39 = vadd.f32 1.0, %v2815_v18  ;;  %v1144_v61 = vpop.f32.mrb[39].mxu0  ;;  %v1143_v63 = vadd.f32 %v1142_v37, %v3921_v16 }
 0x348   : > { %v2328_v19 = vmul.f32 -1.442695, %v1141_v27  ;;  %v1145_v28 = vadd.f32 %v1144_v61, %v3904_v43  ;;  %v1119_v43 = vadd.f32 %v3960_v35, %v3921_v16 }
 0x349   : > { %v2817_v52 = vpop.eup %2816  ;;  %2826 = vrcp.f32 %v1222_v39 }
 0x34a   : > { %v1279_v38 = vmul.f32 %v2817_v52, %v1109_v51  ;;  %2828 = vpow2.f32 %v2328_v19  ;;  %v2329_v53 = vmul.f32 -1.442695, %v1145_v28 }
 0x34b   : > { %v2819_v29 = vpop.eup %2818 }
 0x34c   : > { %v2821_v30 = vpop.eup %2820  ;;  %1299 = vst [vmem:[#allocation2 + $0x60] sm:$0xff] %v1279_v38  ;;  %v1280_v32 = vmul.f32 %v2819_v29, %v1113_v36  ;;  %2830 = vpow2.f32 %v2329_v53 }
 0x34d   : > { %v1223_v41 = vadd.f32 1.0, %v2821_v30 }
 0x34e   : > { %v2823_v40 = vpop.eup %2822  ;;  %1300 = vst [vmem:[#allocation2 + $0x68] sm:$0xff] %v1280_v32 }
 0x34f   : > { %2832 = vrcp.f32 %v1223_v41  ;;  %v1224_v46 = vadd.f32 1.0, %v2823_v40 }
 0x351   : > { %v2825_v24 = vpop.eup %2824  ;;  %2834 = vrcp.f32 %v1224_v46 }
 0x352   : > { %v1281_v44 = vmul.f32 %v2825_v24, %v1119_v43 }
 0x353   : > { %v2827_v48 = vpop.eup %2826 }
 0x354   : > { %v2829_v34 = vpop.eup %2828  ;;  %1301 = vst [vmem:[#allocation2 + $0x70] sm:$0xff] %v1281_v44  ;;  %v1282_v21 = vmul.f32 %v2827_v48, %v1123_v56 }
 0x355   : > { %v1225_v47 = vadd.f32 1.0, %v2829_v34 }
 0x356   : > { %v2831_v31 = vpop.eup %2830  ;;  %1302 = vst [vmem:[#allocation2 + $0x78] sm:$0xff] %v1282_v21 }
 0x357   : > { %2836 = vrcp.f32 %v1225_v47  ;;  %v1226_v54 = vadd.f32 1.0, %v2831_v31 }
 0x359   : > { %v2833_v60 = vpop.eup %2832  ;;  %2838 = vrcp.f32 %v1226_v54 }
 0x35a   : > { %v1283_v35 = vmul.f32 %v2833_v60, %v1129_v17 }
 0x35b   : > { %v2835_v55 = vpop.eup %2834 }
 0x35c   : > { %1303 = vst [vmem:[#allocation2 + $0x80] sm:$0xff] %v1283_v35  ;;  %v1284_v45 = vmul.f32 %v2835_v55, %v1133_v25 }
 0x35e   : > { %1304 = vst [vmem:[#allocation2 + $0x88] sm:$0xff] %v1284_v45 }
 0x360   : > { %1310 = sbr.rel (%p2330_p8) target bundleno = 871 (0x367), region = 80 }
 0x361   : > { %v2837_v20 = vpop.eup %2836 }
 0x362   : > { %v1285_v22 = vmul.f32 %v2837_v20, %v1139_v49 }
 0x363   : > { %v2839_v57 = vpop.eup %2838 }
 0x364   : > { %1305 = vst [vmem:[#allocation2 + $0x90] sm:$0xff] %v1285_v22  ;;  %v1286_v42 = vmul.f32 %v2839_v57, %v1143_v63 }
 0x366   : > { %1306 = vst [vmem:[#allocation2 + $0x98] sm:$0xff] %v1286_v42 }
 0x367 PF: > { %s4433_s6 = sld [smem:[#allocation26_spill]] }
 0x36d   : > { %p2331_p13 = scmp.ne.s32.totalorder %s4433_s6, 1 }
 0x36e   : > { %v3167_v58 = vmov (!%p2331_p13), 0.0  }
 0x36f   : > { %1316 = sbr.rel (%p2331_p13) target bundleno = 886 (0x376), region = 84  ;;  %1317 = vst [vmem:[#allocation2 + $0x48] sm:$0xff] (!%p2331_p13), %v3167_v58  ;;  %1318 = vst [vmem:[#allocation2 + $0x98] sm:$0xff] (!%p2331_p13), %v3167_v58 }
 0x376 PF: > { %v2350_v16 = vcombine.low %v3612_v0, %v3614_v1  ;;  %v2351_v59 = vcombine.low %v3616_v2, %v3618_v3  ;;  %v4007_v33 = vcombine.low %v3620_v4, %v3622_v5  ;;  %s4434_s26 = sld [smem:[#allocation42_spill]]  ;;  %v1320_v27 = vld [vmem:[#allocation2 + $0x5] sm:$0xff]  ;;  %v4014_v37 = vcombine.low %v3624_v6, %v3626_v7  ;;  %v1321_v2 = vld [vmem:[#allocation2 + $0xd] sm:$0xff]  ;;  %v1322_v32 = vld [vmem:[#allocation2 + $0x15] sm:$0xff]  ;;  %s4435_s5 = sld [smem:[#allocation43_spill]] }
 0x377   : > { %v4018_v39 = vcombine.low %v3628_v8, %v3630_v9  ;;  %v4022_v0 = vcombine.low %v3632_v10, %v3634_v11  ;;  %v4026_v1 = vcombine.low %v3636_v12, %v3638_v13  ;;  %v1356_v3 = vld [vmem:[#allocation2 + $0x6] sm:$0xff]  ;;  %v1357_v4 = vld [vmem:[#allocation2 + $0xe] sm:$0xff]  ;;  %v1410_v7 = vsub.s32 2, %v3896_v26  ;;  %v1323_v47 = vld [vmem:[#allocation2 + $0x1d] sm:$0xff]  ;;  %s4436_s24 = sld [smem:[#allocation44_spill]]  ;;  %s2044_s18 = scalar_lea.sflag [#allocation5], %s469_s25 }
 0x378   : > { %2470 = vmatprep.subr.bf16.mxu1 %v2350_v16  ;;  %v1446_v8 = vsub.s32 3, %v3896_v26  ;;  %v4040_v9 = vcombine.low %v3640_v14, %v3642_v15  ;;  %v1392_v10 = vld [vmem:[#allocation2 + $0x7] sm:$0xff]  ;;  %v1393_v11 = vld [vmem:[#allocation2 + $0xf] sm:$0xff]  ;;  %v1482_v13 = vsub.s32 4, %v3896_v26  ;;  %v1554_v61 = vsub.s32 6, %v3896_v26  ;;  %v1359_v25 = vld [vmem:[#allocation2 + $0x1e] sm:$0xff] }
 0x379   : > { %2471 = vmatpush3.bf16.msra.mxu1 %v2350_v16  ;;  %v1428_v12 = vld [vmem:[#allocation2 + $0x8] sm:$0xff]  ;;  %v1429_v14 = vld [vmem:[#allocation2 + $0x10] sm:$0xff]  ;;  %v1395_v63 = vld [vmem:[#allocation2 + $0x1f] sm:$0xff] }
 0x37a   : > { %2472 = vmatprep.subr.bf16.mxu1 %v2351_v59  ;;  %v1464_v15 = vld [vmem:[#allocation2 + $0x9] sm:$0xff]  ;;  %v1465_v52 = vld [vmem:[#allocation2 + $0x11] sm:$0xff]  ;;  %v1431_v42 = vld [vmem:[#allocation2 + $0x20] sm:$0xff] }
 0x37b   : > { %v1500_v29 = vld [vmem:[#allocation2 + $0xa] sm:$0xff]  ;;  %v1537_v40 = vld [vmem:[#allocation2 + $0x13] sm:$0xff] }
 0x37c   : > { %v1319_v18 = vld [vmem:[%s4434_s26] sm:$0x7f]  ;;  %v1536_v41 = vld [vmem:[#allocation2 + $0xb] sm:$0xff]  ;;  %v1358_v31 = vld [vmem:[#allocation2 + $0x16] sm:$0xff] }
 0x37d   : > { %v4030_v5 = vrot.slane %v1319_v18, %v926_v50  ;;  %v4034_v6 = vrot.slane %v1319_v18, %v930_v62  ;;  %v1518_v50 = vsub.s32 5, %v3896_v26  ;;  %v4049_v38 = vrot.slane %v1319_v18, %v1410_v7  ;;  %v1501_v26 = vld [vmem:[#allocation2 + $0x12] sm:$0xff]  ;;  %2473 = vmatpush3.bf16.msra.mxu1 %v2351_v59 }
 0x37e   : > { %v4051_v36 = vrot.slane %v1319_v18, %v1446_v8  ;;  %v4053_v53 = vrot.slane %v1319_v18, %v1482_v13  ;;  %v4057_v46 = vrot.slane %v1319_v18, %v1554_v61  ;;  %2474 = vmatprep.subr.bf16.mxu1 %v4007_v33  ;;  %v1394_v55 = vld [vmem:[#allocation2 + $0x17] sm:$0xff] }
 0x37f   : > { %v1340_v62 = vmul.f32 %v4030_v5, %v1320_v27  ;;  %v1341_v51 = vmul.f32 %v4030_v5, %v1321_v2  ;;  %v1376_v19 = vmul.f32 %v4034_v6, %v1356_v3  ;;  %v1377_v28 = vmul.f32 %v4034_v6, %v1357_v4  ;;  %v1430_v57 = vld [vmem:[#allocation2 + $0x18] sm:$0xff]  ;;  %v1467_v27 = vld [vmem:[#allocation2 + $0x21] sm:$0xff] }
 0x380   : > { %v4055_v30 = vrot.slane %v1319_v18, %v1518_v50  ;;  %v1342_v44 = vmul.f32 %v4030_v5, %v1322_v32  ;;  %v1412_v56 = vmul.f32 %v4049_v38, %v1392_v10  ;;  %v1413_v48 = vmul.f32 %v4049_v38, %v1393_v11  ;;  %v1466_v18 = vld [vmem:[#allocation2 + $0x19] sm:$0xff]  ;;  %v1503_v10 = vld [vmem:[#allocation2 + $0x22] sm:$0xff] }
 0x381   : > { %v1572_v43 = vadd.f32 %v1376_v19, %v1340_v62  ;;  %v1573_v24 = vadd.f32 %v1377_v28, %v1341_v51  ;;  %v1448_v34 = vmul.f32 %v4051_v36, %v1428_v12  ;;  %v1449_v21 = vmul.f32 %v4051_v36, %v1429_v14  ;;  %v1502_v2 = vld [vmem:[#allocation2 + $0x1a] sm:$0xff]  ;;  %2475 = vmatpush3.bf16.msra.mxu1 %v4007_v33  ;;  %v1539_v62 = vld [vmem:[#allocation2 + $0x23] sm:$0xff] }
 0x382   : > { %v1484_v54 = vmul.f32 %v4053_v53, %v1464_v15  ;;  %v1485_v17 = vmul.f32 %v4053_v53, %v1465_v52  ;;  %v1520_v60 = vmul.f32 %v4055_v30, %v1500_v29  ;;  %v1521_v35 = vmul.f32 %v4055_v30, %v1501_v26  ;;  %v1538_v11 = vld [vmem:[#allocation2 + $0x1b] sm:$0xff]  ;;  %2476 = vmatprep.subr.bf16.mxu1 %v4014_v37  ;;  %v1324_v32 = vld [vmem:[#allocation2 + $0x25] sm:$0xff] }
 0x383   : > { %v1556_v45 = vmul.f32 %v4057_v46, %v1536_v41  ;;  %v1557_v49 = vmul.f32 %v4057_v46, %v1537_v40  ;;  %v1588_v20 = vadd.f32 %v1448_v34, %v1412_v56  ;;  %v1589_v22 = vadd.f32 %v1449_v21, %v1413_v48  ;;  %v4082_v33 = vld [vmem:[%s4435_s5] ss:$0 sm:$0xff]  ;;  %v1325_v41 = vld [vmem:[#allocation2 + $0x2d] sm:$0xff] }
 0x384   : > { %v1604_v23 = vadd.f32 %v1520_v60, %v1484_v54  ;;  %v1605_v58 = vadd.f32 %v1521_v35, %v1485_v17  ;;  %v1343_v16 = vmul.f32 %v4030_v5, %v1323_v47  ;;  %v1378_v59 = vmul.f32 %v4034_v6, %v1358_v31  ;;  %v1360_v31 = vld [vmem:[#allocation2 + $0x26] sm:$0xff]  ;;  %v1361_v54 = vld [vmem:[#allocation2 + $0x2e] sm:$0xff] }
 0x385   : > { %v1620_v3 = vadd.f32 %v1588_v20, %v1572_v43  ;;  %v1621_v4 = vadd.f32 %v1589_v22, %v1573_v24  ;;  %v1379_v7 = vmul.f32 %v4034_v6, %v1359_v25  ;;  %v1414_v8 = vmul.f32 %v4049_v38, %v1394_v55  ;;  %2477 = vmatpush3.bf16.msra.mxu1 %v4014_v37  ;;  %v1396_v17 = vld [vmem:[#allocation2 + $0x27] sm:$0xff]  ;;  %v1397_v25 = vld [vmem:[#allocation2 + $0x2f] sm:$0xff] }
 0x386   : > { %v1636_v12 = vadd.f32 %v1604_v23, %v1556_v45  ;;  %v1637_v13 = vadd.f32 %v1605_v58, %v1557_v49  ;;  %v1415_v50 = vmul.f32 %v4049_v38, %v1395_v63  ;;  %v1450_v61 = vmul.f32 %v4051_v36, %v1430_v57  ;;  %2478 = vmatprep.subr.bf16.mxu1 %v4018_v39  ;;  %v1432_v55 = vld [vmem:[#allocation2 + $0x28] sm:$0xff]  ;;  %v1433_v63 = vld [vmem:[#allocation2 + $0x30] sm:$0xff] }
 0x387   : > { %v1451_v51 = vmul.f32 %v4051_v36, %v1431_v42  ;;  %v1486_v19 = vmul.f32 %v4053_v53, %v1466_v18  ;;  %v1487_v28 = vmul.f32 %v4053_v53, %v1467_v27  ;;  %v1522_v14 = vmul.f32 %v4055_v30, %v1502_v2  ;;  %v1468_v57 = vld [vmem:[#allocation2 + $0x29] sm:$0xff]  ;;  %v1505_v27 = vld [vmem:[#allocation2 + $0x32] sm:$0xff] }
 0x388   : > { %v1652_v15 = vadd.f32 %v1636_v12, %v1620_v3  ;;  %v1653_v52 = vadd.f32 %v1637_v13, %v1621_v4  ;;  %v1523_v29 = vmul.f32 %v4055_v30, %v1503_v10  ;;  %v1558_v26 = vmul.f32 %v4057_v46, %v1538_v11  ;;  %v1504_v18 = vld [vmem:[#allocation2 + $0x2a] sm:$0xff] }
 0x389   : > { %v1559_v40 = vmul.f32 %v4057_v46, %v1539_v62  ;;  %v1574_v43 = vadd.f32 %v1378_v59, %v1342_v44  ;;  %v1575_v24 = vadd.f32 %v1379_v7, %v1343_v16  ;;  %v1590_v56 = vadd.f32 %v1450_v61, %v1414_v8  ;;  %2479 = vmatpush3.bf16.msra.mxu1 %v4018_v39  ;;  %v1469_v59 = vld [vmem:[#allocation2 + $0x31] sm:$0xff] }
 0x38a   : > { %v4094_v48 = vadd.f32 %v4082_v33, %v1652_v15  ;;  %v4097_v34 = vadd.f32 %v4082_v33, %v1653_v52  ;;  %v1591_v21 = vadd.f32 %v1451_v51, %v1415_v50  ;;  %v1606_v47 = vadd.f32 %v1522_v14, %v1486_v19  ;;  %2480 = vmatprep.subr.bf16.mxu1 %v4022_v0  ;;  %v1540_v7 = vld [vmem:[#allocation2 + $0x2b] sm:$0xff]  ;;  %v1541_v39 = vld [vmem:[#allocation2 + $0x33] sm:$0xff]  ;;  %v1327_v15 = vld [vmem:[#allocation2 + $0x3d] sm:$0xff] }
 0x38b   : > { %v1607_v60 = vadd.f32 %v1523_v29, %v1487_v28  ;;  %v1622_v37 = vadd.f32 %v1590_v56, %v1574_v43  ;;  %v1344_v35 = vmul.f32 %v4030_v5, %v1324_v32  ;;  %v1345_v44 = vmul.f32 %v4030_v5, %v1325_v41  ;;  %v1326_v62 = vld [vmem:[#allocation2 + $0x35] sm:$0xff] }
 0x38c   : > { %v2333_v45 = vmul.f32 -1.442695, %v4094_v48  ;;  %v2334_v49 = vmul.f32 -1.442695, %v4097_v34  ;;  %v1623_v20 = vadd.f32 %v1591_v21, %v1575_v24  ;;  %v1638_v22 = vadd.f32 %v1606_v47, %v1558_v26  ;;  %v1362_v41 = vld [vmem:[#allocation2 + $0x36] sm:$0xff]  ;;  %v1399_v47 = vld [vmem:[#allocation2 + $0x3f] sm:$0xff] }
 0x38d   : > { %v1639_v42 = vadd.f32 %v1607_v60, %v1559_v40  ;;  %v1380_v23 = vmul.f32 %v4034_v6, %v1360_v31  ;;  %v1381_v58 = vmul.f32 %v4034_v6, %v1361_v54  ;;  %v1416_v16 = vmul.f32 %v4049_v38, %v1396_v17  ;;  %2481 = vmatpush3.bf16.msra.mxu1 %v4022_v0  ;;  %v1363_v40 = vld [vmem:[#allocation2 + $0x3e] sm:$0xff] }
 0x38e   : > { %2840 = vpow2.f32 %v2333_v45  ;;  %v1654_v2 = vadd.f32 %v1638_v22, %v1622_v37  ;;  %v1417_v3 = vmul.f32 %v4049_v38, %v1397_v25  ;;  %v1452_v4 = vmul.f32 %v4051_v36, %v1432_v55  ;;  %2482 = vmatprep.subr.bf16.mxu1 %v4026_v1  ;;  %v1398_v21 = vld [vmem:[#allocation2 + $0x37] sm:$0xff]  ;;  %v1435_v37 = vld [vmem:[#allocation2 + $0x40] sm:$0xff] }
 0x38f   : > { %2842 = vpow2.f32 %v2334_v49  ;;  %v1655_v8 = vadd.f32 %v1639_v42, %v1623_v20  ;;  %v1453_v10 = vmul.f32 %v4051_v36, %v1433_v63  ;;  %v1488_v11 = vmul.f32 %v4053_v53, %v1468_v57  ;;  %v1434_v31 = vld [vmem:[#allocation2 + $0x38] sm:$0xff]  ;;  %v1507_v20 = vld [vmem:[#allocation2 + $0x42] sm:$0xff] }
 0x390   : > { %v4113_v12 = vadd.f32 %v4082_v33, %v1654_v2  ;;  %v1489_v13 = vmul.f32 %v4053_v53, %v1469_v59  ;;  %v1524_v50 = vmul.f32 %v4055_v30, %v1504_v18  ;;  %v1525_v61 = vmul.f32 %v4055_v30, %v1505_v27  ;;  %v1506_v49 = vld [vmem:[#allocation2 + $0x3a] sm:$0xff] }
 0x391   : > { %v4120_v51 = vadd.f32 %v4082_v33, %v1655_v8  ;;  %v1560_v19 = vmul.f32 %v4057_v46, %v1540_v7  ;;  %v1561_v28 = vmul.f32 %v4057_v46, %v1541_v39  ;;  %v1576_v14 = vadd.f32 %v1380_v23, %v1344_v35  ;;  %v1470_v35 = vld [vmem:[#allocation2 + $0x39] sm:$0xff]  ;;  %2483 = vmatpush3.bf16.msra.mxu1 %v4026_v1 }
 0x392   : > { %v2335_v52 = vmul.f32 -1.442695, %v4113_v12  ;;  %v1577_v29 = vadd.f32 %v1381_v58, %v1345_v44  ;;  %v1592_v26 = vadd.f32 %v1452_v4, %v1416_v16  ;;  %v1593_v32 = vadd.f32 %v1453_v10, %v1417_v3  ;;  %v1471_v44 = vld [vmem:[#allocation2 + $0x41] sm:$0xff]  ;;  %2484 = vmatprep.subr.bf16.mxu1 %v4040_v9 }
 0x393   : > { %v2336_v0 = vmul.f32 -1.442695, %v4120_v51  ;;  %v1608_v43 = vadd.f32 %v1524_v50, %v1488_v11  ;;  %v1609_v24 = vadd.f32 %v1525_v61, %v1489_v13  ;;  %v1346_v56 = vmul.f32 %v4030_v5, %v1326_v62  ;;  %v1542_v22 = vld [vmem:[#allocation2 + $0x3b] sm:$0xff]  ;;  %v1543_v58 = vld [vmem:[#allocation2 + $0x43] sm:$0xff] }
 0x394   : > { %2844 = vpow2.f32 %v2335_v52  ;;  %v1624_v54 = vadd.f32 %v1592_v26, %v1576_v14  ;;  %v1625_v17 = vadd.f32 %v1593_v32, %v1577_v29  ;;  %v1347_v60 = vmul.f32 %v4030_v5, %v1327_v15  ;;  %v1329_v14 = vld [vmem:[#allocation2 + $0x5d] sm:$0xff] }
 0x395   : > { %2846 = vpow2.f32 %v2336_v0  ;;  %v1640_v25 = vadd.f32 %v1608_v43, %v1560_v19  ;;  %v1641_v55 = vadd.f32 %v1609_v24, %v1561_v28  ;;  %v1382_v45 = vmul.f32 %v4034_v6, %v1362_v41  ;;  %2485 = vmatpush3.bf16.msra.mxu1 %v4040_v9  ;;  %v1328_v28 = vld [vmem:[#allocation2 + $0x55] sm:$0xff]  ;;  %v1401_v43 = vld [vmem:[#allocation2 + $0x5f] sm:$0xff] }
 0x396   : > { %v1383_v63 = vmul.f32 %v4034_v6, %v1363_v40  ;;  %v1418_v57 = vmul.f32 %v4049_v38, %v1398_v21  ;;  %v1419_v42 = vmul.f32 %v4049_v38, %v1399_v47  ;;  %v1454_v23 = vmul.f32 %v4051_v36, %v1434_v31  ;;  %v1364_v29 = vld [vmem:[#allocation2 + $0x56] sm:$0xff]  ;;  %v1365_v40 = vld [vmem:[#allocation2 + $0x5e] sm:$0xff] }
 0x397   : > { %v1656_v1 = vadd.f32 %v1640_v25, %v1624_v54  ;;  %v1657_v16 = vadd.f32 %v1641_v55, %v1625_v17  ;;  %v1455_v59 = vmul.f32 %v4051_v36, %v1435_v37  ;;  %v1490_v18 = vmul.f32 %v4053_v53, %v1470_v35  ;;  %v1400_v0 = vld [vmem:[#allocation2 + $0x57] sm:$0xff]  ;;  %v1437_v37 = vld [vmem:[#allocation2 + $0x60] sm:$0xff] }
 0x398   : > { %v2841_v27 = vpop.eup %2840  ;;  %v1491_v2 = vmul.f32 %v4053_v53, %v1471_v44  ;;  %v1526_v3 = vmul.f32 %v4055_v30, %v1506_v49  ;;  %v1527_v4 = vmul.f32 %v4055_v30, %v1507_v20  ;;  %v1562_v7 = vmul.f32 %v4057_v46, %v1542_v22  ;;  %v1436_v47 = vld [vmem:[#allocation2 + $0x58] sm:$0xff]  ;;  %v1473_v44 = vld [vmem:[#allocation2 + $0x61] sm:$0xff] }
 0x399   : > { %v2843_v39 = vpop.eup %2842  ;;  %v1739_v8 = vadd.f32 1.0, %v2841_v27  ;;  %v4144_v10 = vadd.f32 %v4082_v33, %v1656_v1  ;;  %v4147_v11 = vadd.f32 %v4082_v33, %v1657_v16  ;;  %v1563_v13 = vmul.f32 %v4057_v46, %v1543_v58  ;;  %v1472_v35 = vld [vmem:[#allocation2 + $0x59] sm:$0xff]  ;;  %v1509_v58 = vld [vmem:[#allocation2 + $0x62] sm:$0xff] }
 0x39a   : > { %v1740_v50 = vadd.f32 1.0, %v2843_v39  ;;  %v1578_v61 = vadd.f32 %v1382_v45, %v1346_v56  ;;  %v1579_v62 = vadd.f32 %v1383_v63, %v1347_v60  ;;  %v1594_v19 = vadd.f32 %v1454_v23, %v1418_v57  ;;  %v1508_v22 = vld [vmem:[#allocation2 + $0x5a] sm:$0xff]  ;;  %v1545_v16 = vld [vmem:[#allocation2 + $0x63] sm:$0xff] }
 0x39b   : > { %2848 = vrcp.f32 %v1739_v8  ;;  %v2337_v15 = vmul.f32 -1.442695, %v4144_v10  ;;  %v2338_v9 = vmul.f32 -1.442695, %v4147_v11  ;;  %v1595_v52 = vadd.f32 %v1455_v59, %v1419_v42  ;;  %v1544_v1 = vld [vmem:[#allocation2 + $0x5b] sm:$0xff] }
 0x39c   : > { %2850 = vrcp.f32 %v1740_v50  ;;  %v1610_v26 = vadd.f32 %v1526_v3, %v1490_v18  ;;  %v1611_v32 = vadd.f32 %v1527_v4, %v1491_v2  ;;  %v1626_v41 = vadd.f32 %v1594_v19, %v1578_v61  ;;  %v1331_v61 = vld [vmem:[#allocation2 + $0x6d] sm:$0xff] }
 0x39d   : > { %2852 = vpow2.f32 %v2337_v15  ;;  %v1627_v24 = vadd.f32 %v1595_v52, %v1579_v62  ;;  %v1348_v56 = vmul.f32 %v4030_v5, %v1328_v28  ;;  %v1349_v21 = vmul.f32 %v4030_v5, %v1329_v14 }
 0x39e   : > { %v2845_v31 = vpop.eup %2844  ;;  %2854 = vpow2.f32 %v2338_v9  ;;  %v1642_v54 = vadd.f32 %v1610_v26, %v1562_v7  ;;  %v1643_v17 = vadd.f32 %v1611_v32, %v1563_v13  ;;  %v1384_v60 = vmul.f32 %v4034_v6, %v1364_v29  ;;  %v1330_v7 = vld [vmem:[#allocation2 + $0x65] sm:$0xff] }
 0x39f   : > { %v2847_v25 = vpop.eup %2846  ;;  %v1741_v55 = vadd.f32 1.0, %v2845_v31  ;;  %v1385_v45 = vmul.f32 %v4034_v6, %v1365_v40  ;;  %v1420_v49 = vmul.f32 %v4049_v38, %v1400_v0  ;;  %v1421_v20 = vmul.f32 %v4049_v38, %v1401_v43  ;;  %v1366_v32 = vld [vmem:[#allocation2 + $0x66] sm:$0xff] }
 0x3a0   : > { %v1742_v63 = vadd.f32 1.0, %v2847_v25  ;;  %v1658_v57 = vadd.f32 %v1642_v54, %v1626_v41  ;;  %v1659_v42 = vadd.f32 %v1643_v17, %v1627_v24  ;;  %v1456_v23 = vmul.f32 %v4051_v36, %v1436_v47  ;;  %v1367_v41 = vld [vmem:[#allocation2 + $0x6e] sm:$0xff] }
 0x3a1   : > { %2856 = vrcp.f32 %v1741_v55  ;;  %v1457_v59 = vmul.f32 %v4051_v36, %v1437_v37  ;;  %v1492_v18 = vmul.f32 %v4053_v53, %v1472_v35  ;;  %v1493_v27 = vmul.f32 %v4053_v53, %v1473_v44  ;;  %v1403_v17 = vld [vmem:[#allocation2 + $0x6f] sm:$0xff] }
 0x3a2   : > { %2858 = vrcp.f32 %v1742_v63  ;;  %v4163_v2 = vadd.f32 %v4082_v33, %v1658_v57  ;;  %v4166_v3 = vadd.f32 %v4082_v33, %v1659_v42  ;;  %v1528_v4 = vmul.f32 %v4055_v30, %v1508_v22  ;;  %v1439_v55 = vld [vmem:[#allocation2 + $0x70] sm:$0xff] }
 0x3a3   : > { %v1529_v39 = vmul.f32 %v4055_v30, %v1509_v58  ;;  %v1564_v8 = vmul.f32 %v4057_v46, %v1544_v1  ;;  %v1565_v13 = vmul.f32 %v4057_v46, %v1545_v16  ;;  %v1580_v50 = vadd.f32 %v1384_v60, %v1348_v56  ;;  %v1402_v56 = vld [vmem:[#allocation2 + $0x67] sm:$0xff]  ;;  %v1511_v1 = vld [vmem:[#allocation2 + $0x72] sm:$0xff] }
 0x3a4   : > { %v2339_v62 = vmul.f32 -1.442695, %v4163_v2  ;;  %v2340_v19 = vmul.f32 -1.442695, %v4166_v3  ;;  %v1581_v28 = vadd.f32 %v1385_v45, %v1349_v21  ;;  %v1596_v14 = vadd.f32 %v1456_v23, %v1420_v49  ;;  %v1438_v60 = vld [vmem:[#allocation2 + $0x68] sm:$0xff] }
 0x3a5   : > { %v2849_v15 = vpop.eup %2848  ;;  %v1597_v9 = vadd.f32 %v1457_v59, %v1421_v20  ;;  %v1612_v52 = vadd.f32 %v1528_v4, %v1492_v18  ;;  %v1613_v29 = vadd.f32 %v1529_v39, %v1493_v27  ;;  %v1350_v26 = vmul.f32 %v4030_v5, %v1330_v7  ;;  %v1474_v45 = vld [vmem:[#allocation2 + $0x69] sm:$0xff]  ;;  %v1547_v7 = vld [vmem:[#allocation2 + $0x73] sm:$0xff] }
 0x3a6   : > { %v2851_v40 = vpop.eup %2850  ;;  %v1787_v0 = vmul.f32 %v2849_v15, %v4094_v48  ;;  %2860 = vpow2.f32 %v2339_v62  ;;  %v1628_v43 = vadd.f32 %v1596_v14, %v1580_v50  ;;  %v1351_v24 = vmul.f32 %v4030_v5, %v1331_v61  ;;  %v1510_v57 = vld [vmem:[#allocation2 + $0x6a] sm:$0xff]  ;;  %v1332_v15 = vld [vmem:[#allocation2 + $0x75] sm:$0xff] }
 0x3a7   : > { %v2853_v47 = vpop.eup %2852  ;;  %v1788_v21 = vmul.f32 %v2851_v40, %v4097_v34  ;;  %2862 = vpow2.f32 %v2340_v19  ;;  %v1629_v31 = vadd.f32 %v1597_v9, %v1581_v28  ;;  %v1644_v54 = vadd.f32 %v1612_v52, %v1564_v8  ;;  %v1475_v34 = vld [vmem:[#allocation2 + $0x71] sm:$0xff] }
 0x3a8   : > { %v2855_v37 = vpop.eup %2854  ;;  %v1743_v35 = vadd.f32 1.0, %v2853_v47  ;;  %v1645_v44 = vadd.f32 %v1613_v29, %v1565_v13  ;;  %v1386_v25 = vmul.f32 %v4034_v6, %v1366_v32  ;;  %v1387_v48 = vmul.f32 %v4034_v6, %v1367_v41  ;;  %v1546_v16 = vld [vmem:[#allocation2 + $0x6b] sm:$0xff]  ;;  %v1333_v32 = vld [vmem:[#allocation2 + $0x7d] sm:$0xff] }
 0x3a9   : > { %v1803_v49 = vpack.c.bf16 %v1788_v21, %v1787_v0  ;;  %v1744_v20 = vadd.f32 1.0, %v2855_v37  ;;  %v1660_v22 = vadd.f32 %v1644_v54, %v1628_v43  ;;  %v1422_v63 = vmul.f32 %v4049_v38, %v1402_v56  ;;  %v1368_v43 = vld [vmem:[#allocation2 + $0x76] sm:$0xff] }
 0x3aa   : > { %2864 = vrcp.f32 %v1743_v35  ;;  %v1661_v42 = vadd.f32 %v1645_v44, %v1629_v31  ;;  %v1423_v23 = vmul.f32 %v4049_v38, %v1403_v17  ;;  %v1458_v58 = vmul.f32 %v4051_v36, %v1438_v60  ;;  %v1369_v31 = vld [vmem:[#allocation2 + $0x7e] sm:$0xff] }
 0x3ab   : > { %v2857_v59 = vpop.eup %2856  ;;  %2486 = vmatprep.mubr.bf16.mxu1 %v1803_v49  ;;  %2866 = vrcp.f32 %v1744_v20  ;;  %v4184_v18 = vadd.f32 %v4082_v33, %v1660_v22  ;;  %v1459_v27 = vmul.f32 %v4051_v36, %v1439_v55  ;;  %v1494_v4 = vmul.f32 %v4053_v53, %v1474_v45  ;;  %v1404_v54 = vld [vmem:[#allocation2 + $0x77] sm:$0xff]  ;;  %v1405_v17 = vld [vmem:[#allocation2 + $0x7f] sm:$0xff] }
 0x3ac   : > { %v2859_v39 = vpop.eup %2858  ;;  %v1789_v8 = vmul.f32 %v2857_v59, %v4113_v12  ;;  %v4190_v13 = vadd.f32 %v4082_v33, %v1661_v42  ;;  %v1495_v50 = vmul.f32 %v4053_v53, %v1475_v34  ;;  %v1530_v61 = vmul.f32 %v4055_v30, %v1510_v57  ;;  %v1440_v44 = vld [vmem:[#allocation2 + $0x78] sm:$0xff]  ;;  %v1441_v49 = vld [vmem:[#allocation2 + $0x80] sm:$0xff] }
 0x3ad   : > { %v1790_v62 = vmul.f32 %v2859_v39, %v4120_v51  ;;  %v2341_v19 = vmul.f32 -1.442695, %v4184_v18  ;;  %v1531_v28 = vmul.f32 %v4055_v30, %v1511_v1  ;;  %v1566_v14 = vmul.f32 %v4057_v46, %v1546_v16  ;;  %v1476_v20 = vld [vmem:[#allocation2 + $0x79] sm:$0xff]  ;;  %v1477_v22 = vld [vmem:[#allocation2 + $0x81] sm:$0xff] }
 0x3ae   : > { %v2342_v9 = vmul.f32 -1.442695, %v4190_v13  ;;  %v1567_v12 = vmul.f32 %v4057_v46, %v1547_v7  ;;  %v1582_v52 = vadd.f32 %v1386_v25, %v1350_v26  ;;  %v1583_v29 = vadd.f32 %v1387_v48, %v1351_v24  ;;  %v1512_v42 = vld [vmem:[#allocation2 + $0x7a] sm:$0xff]  ;;  %v1513_v59 = vld [vmem:[#allocation2 + $0x82] sm:$0xff] }
 0x3af   : > { %v1804_v41 = vpack.c.bf16 %v1790_v62, %v1789_v8  ;;  %2868 = vpow2.f32 %v2341_v19  ;;  %v1598_v40 = vadd.f32 %v1458_v58, %v1422_v63  ;;  %v1599_v0 = vadd.f32 %v1459_v27, %v1423_v23  ;;  %v1548_v27 = vld [vmem:[#allocation2 + $0x7b] sm:$0xff] }
 0x3b0   : > { %v2861_v51 = vpop.eup %2860  ;;  %2870 = vpow2.f32 %v2342_v9  ;;  %v1614_v56 = vadd.f32 %v1530_v61, %v1494_v4  ;;  %v1615_v47 = vadd.f32 %v1531_v28, %v1495_v50  ;;  %v1352_v21 = vmul.f32 %v4030_v5, %v1332_v15  ;;  %v1549_v4 = vld [vmem:[#allocation2 + $0x83] sm:$0xff] }
 0x3b1   : > { %v2863_v60 = vpop.eup %2862  ;;  %2487 = vmatmul.mubr.bf16.vlgmr.msra.gmra.mrb[0].mxu1 %v1804_v41  ;;  %v1745_v37 = vadd.f32 1.0, %v2861_v51  ;;  %v1630_v26 = vadd.f32 %v1598_v40, %v1582_v52  ;;  %v1631_v24 = vadd.f32 %v1599_v0, %v1583_v29  ;;  %v1353_v35 = vmul.f32 %v4030_v5, %v1333_v32  ;;  %v1334_v52 = vld [vmem:[#allocation2 + $0x85] sm:$0xff]  ;;  %v1335_v29 = vld [vmem:[#allocation2 + $0x8d] sm:$0xff] }
 0x3b2   : > { %v1746_v25 = vadd.f32 1.0, %v2863_v60  ;;  %v1646_v48 = vadd.f32 %v1614_v56, %v1566_v14  ;;  %v1647_v55 = vadd.f32 %v1615_v47, %v1567_v12  ;;  %v1388_v45 = vmul.f32 %v4034_v6, %v1368_v43 }
 0x3b3   : > { %2872 = vrcp.f32 %v1745_v37  ;;  %v1389_v63 = vmul.f32 %v4034_v6, %v1369_v31  ;;  %v1424_v34 = vmul.f32 %v4049_v38, %v1404_v54  ;;  %v1425_v57 = vmul.f32 %v4049_v38, %v1405_v17  ;;  %v1370_v31 = vld [vmem:[#allocation2 + $0x86] sm:$0xff]  ;;  %v1371_v37 = vld [vmem:[#allocation2 + $0x8e] sm:$0xff] }
 0x3b4   : > { %v2865_v23 = vpop.eup %2864  ;;  %2874 = vrcp.f32 %v1746_v25  ;;  %v1662_v58 = vadd.f32 %v1646_v48, %v1630_v26  ;;  %v1663_v1 = vadd.f32 %v1647_v55, %v1631_v24  ;;  %v1460_v16 = vmul.f32 %v4051_v36, %v1440_v44  ;;  %v1406_v26 = vld [vmem:[#allocation2 + $0x87] sm:$0xff]  ;;  %v1407_v24 = vld [vmem:[#allocation2 + $0x8f] sm:$0xff] }
 0x3b5   : > { %v2867_v7 = vpop.eup %2866  ;;  %v1791_v39 = vmul.f32 %v2865_v23, %v4144_v10  ;;  %v1461_v8 = vmul.f32 %v4051_v36, %v1441_v49  ;;  %v1496_v50 = vmul.f32 %v4053_v53, %v1476_v20  ;;  %v1497_v61 = vmul.f32 %v4053_v53, %v1477_v22  ;;  %v1442_v48 = vld [vmem:[#allocation2 + $0x88] sm:$0xff]  ;;  %v1443_v20 = vld [vmem:[#allocation2 + $0x90] sm:$0xff] }
 0x3b6   : > { %v1792_v62 = vmul.f32 %v2867_v7, %v4147_v11  ;;  %v4213_v19 = vadd.f32 %v4082_v33, %v1662_v58  ;;  %v4216_v28 = vadd.f32 %v4082_v33, %v1663_v1  ;;  %v1532_v14 = vmul.f32 %v4055_v30, %v1512_v42  ;;  %v1478_v22 = vld [vmem:[#allocation2 + $0x89] sm:$0xff]  ;;  %v1515_v58 = vld [vmem:[#allocation2 + $0x92] sm:$0xff] }
 0x3b7   : > { %v1533_v15 = vmul.f32 %v4055_v30, %v1513_v59  ;;  %v1568_v10 = vmul.f32 %v4057_v46, %v1548_v27  ;;  %v1569_v9 = vmul.f32 %v4057_v46, %v1549_v4  ;;  %v1584_v12 = vadd.f32 %v1388_v45, %v1352_v21  ;;  %v1514_v23 = vld [vmem:[#allocation2 + $0x8a] sm:$0xff] }
 0x3b8   : > { %v1805_v32 = vpack.c.bf16 %v1792_v62, %v1791_v39  ;;  %v2343_v11 = vmul.f32 -1.442695, %v4213_v19  ;;  %v2344_v41 = vmul.f32 -1.442695, %v4216_v28  ;;  %v1585_v40 = vadd.f32 %v1389_v63, %v1353_v35  ;;  %v1479_v63 = vld [vmem:[#allocation2 + $0x91] sm:$0xff] }
 0x3b9   : > { %v2869_v0 = vpop.eup %2868  ;;  %v1600_v43 = vadd.f32 %v1460_v16, %v1424_v34  ;;  %v1601_v51 = vadd.f32 %v1461_v8, %v1425_v57  ;;  %v1616_v56 = vadd.f32 %v1532_v14, %v1496_v50  ;;  %v1617_v47 = vadd.f32 %v1533_v15, %v1497_v61  ;;  %v1550_v7 = vld [vmem:[#allocation2 + $0x8b] sm:$0xff]  ;;  %v1551_v39 = vld [vmem:[#allocation2 + $0x93] sm:$0xff] }
 0x3ba   : > { %v2871_v54 = vpop.eup %2870  ;;  %2490 = vmatprep.mubr.bf16.mxu1 %v1805_v32  ;;  %v1747_v17 = vadd.f32 1.0, %v2869_v0  ;;  %2876 = vpow2.f32 %v2343_v11  ;;  %v1354_v21 = vmul.f32 %v4030_v5, %v1334_v52  ;;  %v1355_v60 = vmul.f32 %v4030_v5, %v1335_v29 }
 0x3bb   : > { %v1748_v44 = vadd.f32 1.0, %v2871_v54  ;;  %2878 = vpow2.f32 %v2344_v41  ;;  %v1632_v35 = vadd.f32 %v1600_v43, %v1584_v12  ;;  %v1633_v25 = vadd.f32 %v1601_v51, %v1585_v40 }
 0x3bc   : > { %2880 = vrcp.f32 %v1747_v17  ;;  %v1648_v55 = vadd.f32 %v1616_v56, %v1568_v10  ;;  %v1649_v45 = vadd.f32 %v1617_v47, %v1569_v9  ;;  %v1390_v49 = vmul.f32 %v4034_v6, %v1370_v31 }
 0x3bd   : > { %v2873_v34 = vpop.eup %2872  ;;  %2882 = vrcp.f32 %v1748_v44  ;;  %v1391_v5 = vmul.f32 %v4034_v6, %v1371_v37  ;;  %v1426_v57 = vmul.f32 %v4049_v38, %v1406_v26  ;;  %v1427_v42 = vmul.f32 %v4049_v38, %v1407_v24 }
 0x3be   : > { %v2875_v1 = vpop.eup %2874  ;;  %v1793_v16 = vmul.f32 %v2873_v34, %v4163_v2  ;;  %v1664_v59 = vadd.f32 %v1648_v55, %v1632_v35  ;;  %v1665_v27 = vadd.f32 %v1649_v45, %v1633_v25  ;;  %v1462_v4 = vmul.f32 %v4051_v36, %v1442_v48 }
 0x3bf   : > { %v1794_v8 = vmul.f32 %v2875_v1, %v4166_v3  ;;  %v1463_v50 = vmul.f32 %v4051_v36, %v1443_v20  ;;  %v1498_v6 = vmul.f32 %v4053_v53, %v1478_v22  ;;  %v1499_v61 = vmul.f32 %v4053_v53, %v1479_v63 }
 0x3c0   : > { %v1687_v38 = vadd.f32 %v4082_v33, %v1664_v59  ;;  %v1688_v62 = vadd.f32 %v4082_v33, %v1665_v27  ;;  %v1534_v2 = vmul.f32 %v4055_v30, %v1514_v23  ;;  %v1535_v14 = vmul.f32 %v4055_v30, %v1515_v58 }
 0x3c1   : > { %v1806_v15 = vpack.c.bf16 %v1794_v8, %v1793_v16  ;;  %v1570_v10 = vmul.f32 %v4057_v46, %v1550_v7  ;;  %v1571_v9 = vmul.f32 %v4057_v46, %v1551_v39  ;;  %v1586_v3 = vadd.f32 %v1390_v49, %v1354_v21  ;;  %v2349_v7 = vld [vmem:[%s4436_s24] ss:$0 sm:$0xff] }
 0x3c2   : > { %v2345_v12 = vmul.f32 -1.442695, %v1687_v38  ;;  %v2346_v36 = vmul.f32 -1.442695, %v1688_v62  ;;  %v1587_v52 = vadd.f32 %v1391_v5, %v1355_v60  ;;  %v1602_v29 = vadd.f32 %v1462_v4, %v1426_v57 }
 0x3c3   : > { %2491 = vmatmul.mubr.bf16.gmra.mrb[4].mxu1 %v1806_v15  ;;  %v1603_v53 = vadd.f32 %v1463_v50, %v1427_v42  ;;  %v1618_v32 = vadd.f32 %v1534_v2, %v1498_v6  ;;  %v1619_v11 = vadd.f32 %v1535_v14, %v1499_v61 }
 0x3c4   : > { %v2877_v41 = vpop.eup %2876  ;;  %2884 = vpow2.f32 %v2345_v12  ;;  %v1634_v40 = vadd.f32 %v1602_v29, %v1586_v3 }
 0x3c5   : > { %v2879_v0 = vpop.eup %2878  ;;  %v1749_v43 = vadd.f32 1.0, %v2877_v41  ;;  %2886 = vpow2.f32 %v2346_v36  ;;  %v1635_v30 = vadd.f32 %v1603_v53, %v1587_v52  ;;  %v1650_v51 = vadd.f32 %v1618_v32, %v1570_v10 }
 0x3c6   : > { %v2881_v56 = vpop.eup %2880  ;;  %v1750_v47 = vadd.f32 1.0, %v2879_v0  ;;  %v1651_v46 = vadd.f32 %v1619_v11, %v1571_v9 }
 0x3c7   : > { %v2883_v31 = vpop.eup %2882  ;;  %v1795_v54 = vmul.f32 %v2881_v56, %v4184_v18  ;;  %2888 = vrcp.f32 %v1749_v43  ;;  %v1666_v17 = vadd.f32 %v1650_v51, %v1634_v40 }
 0x3c8   : > { %v1796_v21 = vmul.f32 %v2883_v31, %v4190_v13  ;;  %2890 = vrcp.f32 %v1750_v47  ;;  %v1667_v60 = vadd.f32 %v1651_v46, %v1635_v30 }
 0x3c9   : > { %v1689_v37 = vadd.f32 %v4082_v33, %v1666_v17 }
 0x3ca   : > { %v1807_v26 = vpack.c.bf16 %v1796_v21, %v1795_v54  ;;  %v1690_v24 = vadd.f32 %v4082_v33, %v1667_v60 }
 0x3cb   : > { %v2347_v44 = vmul.f32 -1.442695, %v1689_v37 }
 0x3cc   : > { %2494 = vmatprep.mubr.bf16.mxu1 %v1807_v26  ;;  %v2348_v35 = vmul.f32 -1.442695, %v1690_v24 }
 0x3cd   : > { %2892 = vpow2.f32 %v2347_v44 }
 0x3ce   : > { %v2885_v25 = vpop.eup %2884  ;;  %2894 = vpow2.f32 %v2348_v35 }
 0x3cf   : > { %v2887_v48 = vpop.eup %2886  ;;  %v1751_v55 = vadd.f32 1.0, %v2885_v25 }
 0x3d0   : > { %v1752_v18 = vadd.f32 1.0, %v2887_v48 }
 0x3d1   : > { %v2889_v45 = vpop.eup %2888  ;;  %2896 = vrcp.f32 %v1751_v55 }
 0x3d2   : > { %v2891_v49 = vpop.eup %2890  ;;  %v1797_v13 = vmul.f32 %v2889_v45, %v4213_v19  ;;  %2898 = vrcp.f32 %v1752_v18 }
 0x3d3   : > { %v1798_v20 = vmul.f32 %v2891_v49, %v4216_v28 }
 0x3d5   : > { %v1808_v22 = vpack.c.bf16 %v1798_v20, %v1797_v13 }
 0x3d7   : > { %v2893_v63 = vpop.eup %2892  ;;  %2495 = vmatmul.mubr.bf16.gmra.mrb[8].mxu1 %v1808_v22 }
 0x3d8   : > { %v2895_v33 = vpop.eup %2894  ;;  %v1753_v34 = vadd.f32 1.0, %v2893_v63 }
 0x3d9   : > { %v1754_v5 = vadd.f32 1.0, %v2895_v33 }
 0x3da   : > { %2900 = vrcp.f32 %v1753_v34 }
 0x3db   : > { %v2897_v57 = vpop.eup %2896  ;;  %2902 = vrcp.f32 %v1754_v5 }
 0x3dc   : > { %v2899_v42 = vpop.eup %2898  ;;  %v1799_v23 = vmul.f32 %v2897_v57, %v1687_v38 }
 0x3dd   : > { %v1800_v58 = vmul.f32 %v2899_v42, %v1688_v62 }
 0x3df   : > { %v1809_v1 = vpack.c.bf16 %v1800_v58, %v1799_v23 }
 0x3e1   : > { %2498 = vmatprep.mubr.bf16.mxu1 %v1809_v1 }
 0x3e4   : > { %v2901_v16 = vpop.eup %2900 }
 0x3e5   : > { %v2903_v59 = vpop.eup %2902  ;;  %v1801_v19 = vmul.f32 %v2901_v16, %v1689_v37 }
 0x3e6   : > { %v1802_v28 = vmul.f32 %v2903_v59, %v1690_v24 }
 0x3e8   : > { %v1810_v27 = vpack.c.bf16 %v1802_v28, %v1801_v19 }
 0x3ea   : > { %2499 = vmatmul.mubr.bf16.gmra.mrb[12].mxu1 %v1810_v27 }
 0x484   : > { %v2488_v4 = vpop.f32.mrb[0].mxu1 }
 0x485   : > { %v1900_v39 = vpop.f32.mrb[1].mxu1  ;;  %v1909_v50 = vadd.f32 %v2488_v4, %v2349_v7 }
 0x486   : > { %v2489_v8 = vpop.f32.mrb[2].mxu1  ;;  %v1901_v38 = vadd.f32 %v2349_v7, %v1900_v39 }
 0x487   : > { %v1912_v6 = vadd.f32 %v2489_v8, %v2349_v7  ;;  %v1903_v61 = vpop.f32.mrb[3].mxu1 }
 0x488   : > { %v1904_v62 = vadd.f32 %v2349_v7, %v1903_v61 }
 0x489   : > { %v2415_v2 = vpack.c.bf16 %v1912_v6, %v1909_v50 }
 0x48a   : > { %v2410_v14 = vpack.c.bf16 %v1904_v62, %v1901_v38 }
 0x48b   : > { %2447 = vst [vmem:[%s3997_s23 + $0x8] sm:$0xff] %v2415_v2  }
 0x48c   : > { %2411 = vst [vmem:[%s3997_s23] sm:$0xff] %v2410_v14  }
 0x496   : > { %v2492_v15 = vpop.f32.mrb[4].mxu1 }
 0x497   : > { %v1916_v10 = vpop.f32.mrb[5].mxu1  ;;  %v1925_v3 = vadd.f32 %v2492_v15, %v2349_v7 }
 0x498   : > { %v2493_v9 = vpop.f32.mrb[6].mxu1  ;;  %v1917_v52 = vadd.f32 %v2349_v7, %v1916_v10 }
 0x499   : > { %v1928_v12 = vadd.f32 %v2493_v9, %v2349_v7  ;;  %v1919_v36 = vpop.f32.mrb[7].mxu1 }
 0x49a   : > { %v1920_v29 = vadd.f32 %v2349_v7, %v1919_v36 }
 0x49b   : > { %v2425_v53 = vpack.c.bf16 %v1928_v12, %v1925_v3 }
 0x49c   : > { %v2420_v32 = vpack.c.bf16 %v1920_v29, %v1917_v52 }
 0x49d   : > { %2449 = vst [vmem:[%s3997_s23 + $0x18] sm:$0xff] %v2425_v53  }
 0x49e   : > { %2448 = vst [vmem:[%s3997_s23 + $0x10] sm:$0xff] %v2420_v32  }
 0x4aa   : > { %v2496_v11 = vpop.f32.mrb[8].mxu1 }
 0x4ab   : > { %v1932_v41 = vpop.f32.mrb[9].mxu1  ;;  %v1941_v0 = vadd.f32 %v2496_v11, %v2349_v7 }
 0x4ac   : > { %v2497_v40 = vpop.f32.mrb[10].mxu1  ;;  %v1933_v51 = vadd.f32 %v2349_v7, %v1932_v41 }
 0x4ad   : > { %v1944_v43 = vadd.f32 %v2497_v40, %v2349_v7  ;;  %v1935_v30 = vpop.f32.mrb[11].mxu1 }
 0x4ae   : > { %v1936_v56 = vadd.f32 %v2349_v7, %v1935_v30 }
 0x4af   : > { %v2435_v47 = vpack.c.bf16 %v1944_v43, %v1941_v0 }
 0x4b0   : > { %v2430_v46 = vpack.c.bf16 %v1936_v56, %v1933_v51 }
 0x4b1   : > { %2451 = vst [vmem:[%s3997_s23 + $0x28] sm:$0xff] %v2435_v47  }
 0x4b2   : > { %2450 = vst [vmem:[%s3997_s23 + $0x20] sm:$0xff] %v2430_v46  }
 0x4bd   : > { %v2500_v31 = vpop.f32.mrb[12].mxu1 }
 0x4be   : > { %v1948_v54 = vpop.f32.mrb[13].mxu1  ;;  %v1957_v21 = vadd.f32 %v2500_v31, %v2349_v7 }
 0x4bf   : > { %v2501_v17 = vpop.f32.mrb[14].mxu1  ;;  %v1949_v26 = vadd.f32 %v2349_v7, %v1948_v54 }
 0x4c0   : > { %v1960_v60 = vadd.f32 %v2501_v17, %v2349_v7  ;;  %v1951_v37 = vpop.f32.mrb[15].mxu1 }
 0x4c1   : > { %v1952_v24 = vadd.f32 %v2349_v7, %v1951_v37 }
 0x4c2   : > { %v2445_v44 = vpack.c.bf16 %v1960_v60, %v1957_v21 }
 0x4c3   : > { %v2440_v35 = vpack.c.bf16 %v1952_v24, %v1949_v26 }
 0x4c4   : > { %2453 = vst [vmem:[%s3997_s23 + $0x38] sm:$0xff] %v2445_v44  }
 0x4c5   : > { %2452 = vst [vmem:[%s3997_s23 + $0x30] sm:$0xff] %v2440_v35  }
 0x4c6   : > { %s4438_s29 = sld [smem:[#allocation26_spill]]  ;;  %s4439_s19 = sld [smem:[#allocation27_spill]] }
 0x4c7   : > { %s4440_s13 = sld [smem:[#allocation37_spill]]  ;;  %s2076_s6 = sshll.u32 %s3997_s23, 4  ;;  %s2077_s6 = int_to_ptr.vmem [resolvable:$true] %s2076_s6 }
 0x4c8   : > { %s4441_s8 = sld [smem:[#allocation45_spill]]  ;;  %s3168_s15 = smov 512  }
 0x4c9   : > { %s3169_s5 = smov 1024   ;;  %s3170_s4 = smov 8  }
 0x4ca   : > { %s3171_s2 = smov 64   ;;  %s3172_s23 = smov 4  }
 0x4cb   : > { %s3173_s24 = smov [#allocation15]   ;;  %s3174_s9 = smov 0  }
 0x4cc   : > { %s2376_s27 = sshll.u32 %s4438_s29, 3  ;;  %s2406_s12 = sshll.u32 %s4439_s19, 5 }
 0x4cd   : > { %s2057_s30 = sadd.s32 %s2406_s12, %s2376_s27  ;;  %p4442_p6 = scmp.ne.s32.totalorder %s4440_s13, 0 }
 0x4ce   : > { %s2378_s10 = sshll.u32 %s2057_s30, 6 }
 0x4cf   : > { %s2059_s25 = scalar_lea.hbm %s4441_s8, %s2378_s10  ;;  %2523 = sst [smem:[#allocation16]] (%p4442_p6), %s3168_s15 }
 0x4d0   : > { %2524 = sst [smem:[#allocation16 + $0x1]] (%p4442_p6), %s3169_s5 }
 0x4d1   : > { %2525 = sst [smem:[#allocation16 + $0x2]] (%p4442_p6), %s3170_s4 }
 0x4d2   : > { %2526 = sst [smem:[#allocation16 + $0x3]] (%p4442_p6), %s3171_s2 }
 0x4d3   : > { %2527 = sst [smem:[#allocation16 + $0x4]] (%p4442_p6), %s3171_s2 }
 0x4d4   : > { %2528 = sst [smem:[#allocation16 + $0x5]] (%p4442_p6), %s3172_s23 }
 0x4d5   : > { %2529 = dma.general (%p4442_p6), %s2077_s6, 1024, %s2059_s25, %s2044_s18, %s3173_s24, [#allocation16], %s3174_s9, 0  }
 0x4d6 PF: > { %s4443_s29 = sld [smem:[#allocation24_spill]]  ;;  %p2546_p0 = scmp.ge.s32.totalorder %s3146_s22, 2 }
 0x4d7   : > { %s4444_s19 = sld [smem:[#allocation39_spill]] }
 0x4dc   : > { %s2104_s27 = sand.u32 1, %s4443_s29  }
 0x4dd   : > { %p4445_p11 = scmp.ne.s32.totalorder %s4444_s19, 0  ;;  %s2105_s12 = scalar_lea.sflag [#allocation5], %s2104_s27 }
 0x4df   : > { %p2539_p12 = pnand %p2546_p0, %p4445_p11 }
 0x4e1   : > { %3089 = dma.done.wait (!%p2539_p12), %s2105_s12, 1024  }
 0x4e2   : > { %3091 = vsyncadd (!%p2539_p12), %s2105_s12, 4294966272  ;;  %s29_s22 = sadd.s32 1, %s3146_s22   ;;  %s4447_s10 = sld [smem:[#allocation23_spill]] }
 0x4e3   : > { %p4286_p4 = scmp.ge.s32.totalorder %s29_s22, 6   ;;  %s4448_s18 = sld [smem:[#allocation38_spill]] }
 0x4e4   : > { %s4449_s12 = sld [smem:[#allocation25_spill]]  ;;  %s4450_s6 = sld [smem:[#allocation34_spill]] }
 0x4e5   : > { %s4451_s20 = sld [smem:[#allocation33_spill]]  ;;  %s4452_s26 = sld [smem:[#allocation28_spill]] }
 0x4e6   : > { %s4453_s8 = sld [smem:[#allocation30_spill]]  ;;  %s4454_s25 = sld [smem:[#allocation31_spill]] }
 0x4e7   : > { %s4459_s13 = smov %s3114_s14  ;;  %s4461_s15 = smov %s3122_s16 }
 0x4e8   : > { %s4456_s30 = smov %s4447_s10  ;;  %s4457_s10 = smov %s3102_s11 }
 0x4e9   : > { %s4458_s11 = smov %s4448_s18  ;;  %s4462_s16 = smov %s3126_s17 }
 0x4ea   : > { %s4460_s14 = smov %s4450_s6  ;;  %s4465_s19 = smov %s3142_s21 }
 0x4eb   : > { %s4463_s17 = smov %s4451_s20  ;;  %s4464_s18 = smov %s4452_s26 }
 0x4ec   : > { %s4466_s20 = smov %s4453_s8  ;;  %s4467_s21 = smov %s4454_s25 }
 0x4ed   :  { %28 = sbr.rel (!%p4286_p4) target bundleno = 20 (0x14), region = 151 }
 0x4f4   :  { %2110 = vsyncpa [#allocation4], 1 }
 0x4f5   :  { %2112 = vsyncpa [#allocation4 + $0x1], 1 }
 0x4f6   :  { %2113 = vsyncpa [#allocation7], 1 }
 0x4f7   :  { %2115 = vsyncpa [#allocation7 + $0x1], 1 }
 0x4f8   :  { %2116 = vsyncpa [#allocation10], 1 }
 0x4f9   :  { %2117 = vsyncpa [#allocation5], 1 }
 0x4fa   :  { %2119 = vsyncpa [#allocation5 + $0x1], 1 }

</bundles_post_ra>
